<compile_context>
chip_gen: v7x
topology: tpu7x:2x2x1
jax: 0.10.0
libtpu: 0.0.40
codegen_flags: <defaults>
</compile_context>

<pallas_src>
import functools
import math

import jax
import jax.numpy as jnp
from jax.experimental import pallas as pl
from jax.experimental.pallas import tpu as pltpu

EPS = 1e-5
H1, H2, H3 = 512, 256, 256
_NPARAM_ROWS = 8   # packed (8, H1) rows: b1, g1, be1, scale1, b2, g2, be2, b3


# ------------------------------ kernel ------------------------------------ #

def _bn_grouped(h, g, be, num_groups):
    """Training-mode BatchNorm1d with per-group (per siamese branch) stats.

    Grouped via reshape + axis=1 stats (no slice loop / concat) and a
    two-pass centered variance.
    """
    rows, feat = h.shape
    hg = h.reshape(num_groups, rows // num_groups, feat)
    mu = jnp.mean(hg, axis=1, keepdims=True)
    c = hg - mu
    var = jnp.mean(c * c, axis=1, keepdims=True)
    out = c * jax.lax.rsqrt(var + EPS) * g + be
    return out.reshape(rows, feat)


def _siamese_kernel(*refs, num_branches, batch_per_branch):
    x_refs = refs[:num_branches]
    w1_ref, pv_ref, w2_ref, w3_ref, o_ref, acc_ref = refs[num_branches:]

    k = pl.program_id(0)

    @pl.when(k == 0)
    def _():
        acc_ref[...] = jnp.zeros_like(acc_ref)

    # ---- fc1 partial matmul on this K tile ----
    # int8 weight tile -> bf16 (exact), f32 accumulate; per-channel scale is
    # applied once in the epilogue.  The same weight tile is reused by every
    # branch (key amortization on a weight-BW-bound kernel).
    w1b = w1_ref[...].astype(jnp.bfloat16)
    for bi, x_ref in enumerate(x_refs):            # static unroll over branches
        acc_ref[pl.ds(bi * batch_per_branch, batch_per_branch), :] += jnp.dot(
            x_ref[...].astype(jnp.bfloat16), w1b,
            preferred_element_type=jnp.float32)

    @pl.when(k == pl.num_programs(0) - 1)
    def _():
        pv = pv_ref[...]                           # (8, 512) packed small params
        b1, g1, be1, sc1 = pv[0:1, :], pv[1:2, :], pv[2:3, :], pv[3:4, :]
        b2, g2, be2 = pv[4:5, :H2], pv[5:6, :H2], pv[6:7, :H2]
        b3 = pv[7:8, :H3]

        # ---- fc1 epilogue: dequant scale + bias + ReLU + BatchNorm1d(512) ----
        h = jnp.maximum(acc_ref[...] * sc1 + b1, 0.0)
        h = _bn_grouped(h, g1, be1, num_branches)

        # ---- fc2: Linear(512, 256) + ReLU + BatchNorm1d(256) ----
        h = jnp.dot(h.astype(jnp.bfloat16), w2_ref[...],
                    preferred_element_type=jnp.float32) + b2
        h = jnp.maximum(h, 0.0)
        h = _bn_grouped(h, g2, be2, num_branches)

        # ---- fc3: Linear(256, 256) ----
        out = jnp.dot(h.astype(jnp.bfloat16), w3_ref[...],
                      preferred_element_type=jnp.float32) + b3
        o_ref[...] = out.astype(o_ref.dtype)


# ------------------------------ wrapper ------------------------------------ #

def _vmem_budget_bytes():
    """Returns (tile-buffer budget, vmem_limit_bytes), generation-aware."""
    try:
        cap = int(pltpu.get_tpu_info().vmem_capacity_bytes)
    except Exception:
        cap = 64 << 20
    if cap <= (64 << 20):          # v7x-class: 64 MiB/TC -> leave headroom
        return 24 << 20, 48 << 20
    return 48 << 20, 64 << 20      # v5e/v6e: 128 MiB physical, raise scoped limit


def _pick_tk(K_pad, rows, max_tk):
    """Largest 128-multiple tk dividing K_pad that fits the VMEM tile budget."""
    budget, vmem_limit = _vmem_budget_bytes()
    resident = (2 * (H1 * H2 * 2 + H2 * H3 * 2 + _NPARAM_ROWS * H1 * 4)  # w2,w3,pv (x2 bufs)
                + rows * (H1 + 2 * H3) * 4)                              # acc + out bufs
    per_tk = 2 * H1 * 1 + 2 * rows * 4     # dbl-buffered w1 (int8) + x (f32) per tk unit
    cap = max(128, (budget - resident) // per_tk)
    if max_tk is not None:
        cap = min(cap, max_tk)
    t = min(cap, K_pad)
    t -= t % 128
    t = max(t, 128)
    while t > 128 and K_pad % t != 0:
        t -= 128
    return t, vmem_limit


def _run(x_list, params, max_tk):
    w1_q, pv, w2, w3 = params
    K_pad = w1_q.shape[0]
    nb = len(x_list)
    Bt = x_list[0].shape[0]
    rows = nb * Bt

    # Zero-pad flattened inputs to the 128-aligned padded K of w1 (no-op when
    # in_features is already a multiple of 128, as in the demo).
    xs = []
    for x in x_list:
        if x.shape[1] < K_pad:
            x = jnp.pad(x, ((0, 0), (0, K_pad - x.shape[1])))
        xs.append(x)

    tk, vmem_limit = _pick_tk(K_pad, rows, max_tk)
    nk = K_pad // tk

    flops = 2 * rows * (K_pad * H1 + H1 * H2 + H2 * H3)
    bytes_accessed = (K_pad * H1                       # int8 w1
                      + 2 * (H1 * H2 + H2 * H3)        # bf16 w2, w3
                      + 4 * _NPARAM_ROWS * H1          # packed small params
                      + 4 * rows * K_pad               # f32 inputs
                      + 4 * rows * H3)                 # f32 output
    cost = pl.CostEstimate(flops=flops, transcendentals=nb * (H1 + H2),
                           bytes_accessed=bytes_accessed)

    x_specs = [pl.BlockSpec((Bt, tk), lambda k: (0, k)) for _ in range(nb)]
    grid_spec = pltpu.PrefetchScalarGridSpec(
        num_scalar_prefetch=0,
        grid=(nk,),                                          # fc1 reduction axis
        in_specs=x_specs + [
            pl.BlockSpec((tk, H1), lambda k: (k, 0)),        # w1 int8 (K-tiled, pipelined)
            pl.BlockSpec((_NPARAM_ROWS, H1), lambda k: (0, 0)),  # packed bias/gamma/beta/scale
            pl.BlockSpec((H1, H2), lambda k: (0, 0)),        # w2 (resident)
            pl.BlockSpec((H2, H3), lambda k: (0, 0)),        # w3 (resident)
        ],
        out_specs=pl.BlockSpec((rows, H3), lambda k: (0, 0)),
        scratch_shapes=[pltpu.VMEM((rows, H1), jnp.float32)],   # fc1 accumulator
    )

    return pl.pallas_call(
        functools.partial(_siamese_kernel, num_branches=nb, batch_per_branch=Bt),
        out_shape=jax.ShapeDtypeStruct((rows, H3), jnp.float32),
        grid_spec=grid_spec,
        compiler_params=pltpu.CompilerParams(
            dimension_semantics=("arbitrary",),              # K is a reduction axis
            vmem_limit_bytes=vmem_limit),
        cost_estimate=cost,
    )(*xs, w1_q, pv, w2, w3)


@functools.partial(jax.jit, static_argnames=("max_tk",))
def siamese_forward(x_nchw, params, max_tk=None):
    """Single branch: x_nchw (B, 3, H, W) -> (B, 256). Matches module.forward."""
    B = x_nchw.shape[0]
    return _run([x_nchw.reshape(B, -1)], params, max_tk)


@functools.partial(jax.jit, static_argnames=("max_tk",))
def siamese_forward_pair(x1_nchw, x2_nchw, params, max_tk=None):
    """Both siamese branches in ONE pallas_call.

    x1/x2 are passed as two K-tiled kernel inputs (no host concat / cast), so
    every w1 tile fetched from HBM is reused by both branches.  BatchNorm
    statistics are computed per branch inside the kernel, matching two
    independent forward passes.
    """
    B = x1_nchw.shape[0]
    out = _run([x1_nchw.reshape(B, -1), x2_nchw.reshape(B, -1)], params, max_tk)
    return out[:B], out[B:]


# ------------------------------ params / reference ------------------------- #

def init_params(key, in_features):
    """PyTorch-default-style init.

    fc1 weight: int8 (K_pad, 512) with per-output-channel f32 scales (K padded
    to a multiple of 128 with zero rows).  fc2/fc3 weights: bf16, stored
    transposed (in, out).  Biases / BN affine params / scales packed into one
    (8, 512) f32 buffer: rows = [b1, g1, be1, scale1, b2, g2, be2, b3].
    """
    K_pad = ((in_features + 127) // 128) * 128

    def linear(k, fan_in, fan_out):
        kw, kb = jax.random.split(k)
        bound = 1.0 / math.sqrt(fan_in)
        w = jax.random.uniform(kw, (fan_in, fan_out), jnp.float32, -bound, bound)
        b = jax.random.uniform(kb, (fan_out,), jnp.float32, -bound, bound)
        return w, b

    k1, k2, k3 = jax.random.split(key, 3)
    w1, b1 = linear(k1, in_features, H1)
    w2, b2 = linear(k2, H1, H2)
    w3, b3 = linear(k3, H2, H3)

    # Per-output-channel symmetric int8 quantization of the dominant fc1 weight.
    scale1 = jnp.maximum(jnp.max(jnp.abs(w1), axis=0), 1e-12) / 127.0
    w1_q = jnp.clip(jnp.round(w1 / scale1), -127, 127).astype(jnp.int8)
    w1_q = jnp.pad(w1_q, ((0, K_pad - in_features), (0, 0)))

    def row(v):
        v = v.reshape(1, -1)
        return jnp.pad(v, ((0, 0), (0, H1 - v.shape[1])))

    g1, be1 = jnp.ones((H1,), jnp.float32), jnp.zeros((H1,), jnp.float32)
    g2, be2 = jnp.ones((H2,), jnp.float32), jnp.zeros((H2,), jnp.float32)
    pv = jnp.concatenate(
        [row(b1), row(g1), row(be1), row(scale1),
         row(b2), row(g2), row(be2), row(b3)], axis=0).astype(jnp.float32)

    return (w1_q, pv, w2.astype(jnp.bfloat16), w3.astype(jnp.bfloat16))


def reference_forward(x_nchw, params):
    """Pure-JAX reference using the same int8-w1 / bf16 / f32-accumulate math."""
    w1_q, pv, w2, w3 = params
    b1, g1, be1, sc1 = pv[0:1, :], pv[1:2, :], pv[2:3, :], pv[3:4, :]
    b2, g2, be2, b3 = pv[4:5, :H2], pv[5:6, :H2], pv[6:7, :H2], pv[7:8, :H3]

    B = x_nchw.shape[0]
    x = x_nchw.reshape(B, -1)
    K_pad = w1_q.shape[0]
    if x.shape[1] < K_pad:
        x = jnp.pad(x, ((0, 0), (0, K_pad - x.shape[1])))

    h = jnp.dot(x.astype(jnp.bfloat16), w1_q.astype(jnp.bfloat16),
                preferred_element_type=jnp.float32) * sc1 + b1
    h = jnp.maximum(h, 0.0)
    h = _bn_grouped(h, g1, be1, 1)
    h = jnp.dot(h.astype(jnp.bfloat16), w2,
                preferred_element_type=jnp.float32) + b2
    h = jnp.maximum(h, 0.0)
    h = _bn_grouped(h, g2, be2, 1)
    return jnp.dot(h.astype(jnp.bfloat16), w3,
                   preferred_element_type=jnp.float32) + b3


# ------------------------------ demo ---------------------------------------- #

if __name__ == "__main__":
    # img_height = img_width = 16 -> in_features = 3*16*16 = 768
    B, C, Hh, Ww = 8, 3, 16, 16
    key = jax.random.PRNGKey(0)
    kx1, kx2, kp = jax.random.split(key, 3)
    x1 = jax.random.normal(kx1, (B, C, Hh, Ww), jnp.float32)
    x2 = jax.random.normal(kx2, (B, C, Hh, Ww), jnp.float32)
    params = init_params(kp, C * Hh * Ww)

    # Single-branch forward (matches module.forward).  max_tk=256 forces a
    # 3-step K grid so the tiled accumulator / pipelined-w1 path is exercised.
    out = jax.block_until_ready(siamese_forward(x1, params, max_tk=256))
    ref = reference_forward(x1, params)
    assert out.shape == (B, H3)
    assert jnp.allclose(out, ref, atol=1e-2, rtol=1e-2), "single-branch mismatch"

    # Fused siamese pair: one pallas_call, weights DMA'd once and reused by
    # both branches, per-branch BN stats, no host-side concat/cast.
    o1, o2 = siamese_forward_pair(x1, x2, params, max_tk=256)
    o1, o2 = jax.block_until_ready((o1, o2))
    assert jnp.allclose(o1, reference_forward(x1, params), atol=1e-2, rtol=1e-2)
    assert jnp.allclose(o2, reference_forward(x2, params), atol=1e-2, rtol=1e-2)

    print("KERNEL_OK")
</pallas_src>

<mosaic_0001>
module attributes {stable_mosaic.version = 11 : i64} {
  func.func @_siamese_kernel(%arg0: i32, %arg1: memref<8x256xf32, #tpu.memory_space<vmem>>, %arg2: memref<256x512xi8, #tpu.memory_space<vmem>>, %arg3: memref<8x512xf32, #tpu.memory_space<vmem>>, %arg4: memref<512x256xbf16, #tpu.memory_space<vmem>>, %arg5: memref<256x256xbf16, #tpu.memory_space<vmem>>, %arg6: memref<8x256xf32, #tpu.memory_space<vmem>>, %arg7: memref<8x512xf32, #tpu.memory_space<vmem>>) attributes {dimension_semantics = [#tpu.dimension_semantics<arbitrary>], iteration_bounds = array<i64: 3>, scalar_prefetch = 0 : i64, scratch_operands = 1 : i64, tpu.core_type = #tpu.core_type<tc>, window_params = [{transform_indices = @transform_0, window_bounds = array<i64: 8, 256>}, {transform_indices = @transform_1, window_bounds = array<i64: 256, 512>}, {pipeline_mode = #tpu.pipeline_mode<synchronous>, transform_indices = @transform_2, window_bounds = array<i64: 8, 512>}, {pipeline_mode = #tpu.pipeline_mode<synchronous>, transform_indices = @transform_3, window_bounds = array<i64: 512, 256>}, {pipeline_mode = #tpu.pipeline_mode<synchronous>, transform_indices = @transform_4, window_bounds = array<i64: 256, 256>}, {pipeline_mode = #tpu.pipeline_mode<synchronous>, transform_indices = @transform_5, window_bounds = array<i64: 8, 256>}]} {
    %c0_i32 = arith.constant 0 : i32
    %0 = arith.cmpi eq, %arg0, %c0_i32 : i32
    %1 = arith.extui %0 : i1 to i32
    %c0_i32_0 = arith.constant 0 : i32
    %2 = arith.cmpi ne, %1, %c0_i32_0 : i32
    scf.if %2 {
      %cst_9 = arith.constant 0.000000e+00 : f32
      %14 = vector.broadcast %cst_9 : f32 to vector<8x512xf32>
      %c0_10 = arith.constant 0 : index
      %c0_11 = arith.constant 0 : index
      %15 = vector.load %arg7[%c0_10, %c0_11] : memref<8x512xf32, #tpu.memory_space<vmem>>, vector<8x512xf32>
      tpu.vector_store %arg7[%c0_10, %c0_11], %14 {strides = array<i32>} : memref<8x512xf32, #tpu.memory_space<vmem>>, vector<8x512xf32>,
    } else {
    }
    %c0 = arith.constant 0 : index
    %c0_1 = arith.constant 0 : index
    %3 = vector.load %arg2[%c0, %c0_1] : memref<256x512xi8, #tpu.memory_space<vmem>>, vector<256x512xi8>
    %4 = arith.sitofp %3 : vector<256x512xi8> to vector<256x512xbf16>
    %c0_2 = arith.constant 0 : index
    %c0_3 = arith.constant 0 : index
    %5 = vector.load %arg7[%c0_2, %c0_3] : memref<8x512xf32, #tpu.memory_space<vmem>>, vector<8x512xf32>
    %c0_4 = arith.constant 0 : index
    %c0_5 = arith.constant 0 : index
    %6 = vector.load %arg1[%c0_4, %c0_5] : memref<8x256xf32, #tpu.memory_space<vmem>>, vector<8x256xf32>
    %7 = arith.truncf %6 : vector<8x256xf32> to vector<8x256xbf16>
    %cst = arith.constant dense<0.000000e+00> : vector<8x512xf32>
    %8 = tpu.matmul %7, %4, %cst {dimension_numbers = #tpu.dot_dimension_numbers<[1], [0], [0], [1], [0, 0, 1, 1], [], []>} : vector<8x256xbf16>, vector<256x512xbf16>, vector<8x512xf32> -> vector<8x512xf32>
    %9 = arith.addf %5, %8 : vector<8x512xf32>
    %c0_6 = arith.constant 0 : index
    %c0_7 = arith.constant 0 : index
    %10 = vector.load %arg7[%c0_6, %c0_7] : memref<8x512xf32, #tpu.memory_space<vmem>>, vector<8x512xf32>
    tpu.vector_store %arg7[%c0_6, %c0_7], %9 {strides = array<i32>} : memref<8x512xf32, #tpu.memory_space<vmem>>, vector<8x512xf32>,
    %c2_i32 = arith.constant 2 : i32
    %11 = arith.cmpi eq, %arg0, %c2_i32 : i32
    %12 = arith.extui %11 : i1 to i32
    %c0_i32_8 = arith.constant 0 : i32
    %13 = arith.cmpi ne, %12, %c0_i32_8 : i32
    scf.if %13 {
      %c0_9 = arith.constant 0 : index
      %c0_10 = arith.constant 0 : index
      %14 = vector.load %arg3[%c0_9, %c0_10] : memref<8x512xf32, #tpu.memory_space<vmem>>, vector<8x512xf32>
      %15 = vector.extract_strided_slice %14 {offsets = [0, 0], sizes = [1, 512], strides = [1, 1]} : vector<8x512xf32> to vector<1x512xf32>
      %16 = vector.extract_strided_slice %14 {offsets = [1, 0], sizes = [1, 512], strides = [1, 1]} : vector<8x512xf32> to vector<1x512xf32>
      %17 = vector.extract_strided_slice %14 {offsets = [2, 0], sizes = [1, 512], strides = [1, 1]} : vector<8x512xf32> to vector<1x512xf32>
      %18 = vector.extract_strided_slice %14 {offsets = [3, 0], sizes = [1, 512], strides = [1, 1]} : vector<8x512xf32> to vector<1x512xf32>
      %19 = vector.extract_strided_slice %14 {offsets = [4, 0], sizes = [1, 256], strides = [1, 1]} : vector<8x512xf32> to vector<1x256xf32>
      %20 = vector.extract_strided_slice %14 {offsets = [5, 0], sizes = [1, 256], strides = [1, 1]} : vector<8x512xf32> to vector<1x256xf32>
      %21 = vector.extract_strided_slice %14 {offsets = [6, 0], sizes = [1, 256], strides = [1, 1]} : vector<8x512xf32> to vector<1x256xf32>
      %22 = vector.extract_strided_slice %14 {offsets = [7, 0], sizes = [1, 256], strides = [1, 1]} : vector<8x512xf32> to vector<1x256xf32>
      %c0_11 = arith.constant 0 : index
      %c0_12 = arith.constant 0 : index
      %23 = vector.load %arg7[%c0_11, %c0_12] : memref<8x512xf32, #tpu.memory_space<vmem>>, vector<8x512xf32>
      %24 = vector.broadcast %18 : vector<1x512xf32> to vector<8x512xf32>
      %25 = arith.mulf %23, %24 : vector<8x512xf32>
      %26 = vector.broadcast %15 : vector<1x512xf32> to vector<8x512xf32>
      %27 = arith.addf %25, %26 : vector<8x512xf32>
      %cst_13 = arith.constant 0.000000e+00 : f32
      %28 = vector.broadcast %cst_13 : f32 to vector<8x512xf32>
      %29 = arith.maximumf %27, %28 : vector<8x512xf32>
      %30 = vector.shape_cast %29 : vector<8x512xf32> to vector<1x8x512xf32>
      %cst_14 = arith.constant dense<0.000000e+00> : vector<1x512xf32>
      %31 = vector.multi_reduction <add>, %30, %cst_14 [1] : vector<1x8x512xf32> to vector<1x512xf32>
      %32 = vector.shape_cast %31 : vector<1x512xf32> to vector<1x1x512xf32>
      %cst_15 = arith.constant 8.000000e+00 : f32
      %33 = vector.broadcast %cst_15 : f32 to vector<1x1x512xf32>
      %34 = arith.divf %32, %33 : vector<1x1x512xf32>
      %35 = vector.broadcast %34 : vector<1x1x512xf32> to vector<1x8x512xf32>
      %36 = arith.subf %30, %35 : vector<1x8x512xf32>
      %37 = arith.mulf %36, %36 : vector<1x8x512xf32>
      %cst_16 = arith.constant dense<0.000000e+00> : vector<1x512xf32>
      %38 = vector.multi_reduction <add>, %37, %cst_16 [1] : vector<1x8x512xf32> to vector<1x512xf32>
      %39 = vector.shape_cast %38 : vector<1x512xf32> to vector<1x1x512xf32>
      %cst_17 = arith.constant 8.000000e+00 : f32
      %40 = vector.broadcast %cst_17 : f32 to vector<1x1x512xf32>
      %41 = arith.divf %39, %40 : vector<1x1x512xf32>
      %cst_18 = arith.constant 9.99999974E-6 : f32
      %42 = vector.broadcast %cst_18 : f32 to vector<1x1x512xf32>
      %43 = arith.addf %41, %42 : vector<1x1x512xf32>
      %44 = math.rsqrt %43 : vector<1x1x512xf32>
      %45 = vector.broadcast %44 : vector<1x1x512xf32> to vector<1x8x512xf32>
      %46 = arith.mulf %36, %45 : vector<1x8x512xf32>
      %47 = vector.shape_cast %16 : vector<1x512xf32> to vector<1x1x512xf32>
      %48 = vector.broadcast %47 : vector<1x1x512xf32> to vector<1x8x512xf32>
      %49 = arith.mulf %46, %48 : vector<1x8x512xf32>
      %50 = vector.shape_cast %17 : vector<1x512xf32> to vector<1x1x512xf32>
      %51 = vector.broadcast %50 : vector<1x1x512xf32> to vector<1x8x512xf32>
      %52 = arith.addf %49, %51 : vector<1x8x512xf32>
      %53 = vector.shape_cast %52 : vector<1x8x512xf32> to vector<8x512xf32>
      %54 = arith.truncf %53 : vector<8x512xf32> to vector<8x512xbf16>
      %c0_19 = arith.constant 0 : index
      %c0_20 = arith.constant 0 : index
      %55 = vector.load %arg4[%c0_19, %c0_20] : memref<512x256xbf16, #tpu.memory_space<vmem>>, vector<512x256xbf16>
      %cst_21 = arith.constant dense<0.000000e+00> : vector<8x256xf32>
      %56 = tpu.matmul %54, %55, %cst_21 {dimension_numbers = #tpu.dot_dimension_numbers<[1], [0], [0], [1], [0, 0, 1, 1], [], []>} : vector<8x512xbf16>, vector<512x256xbf16>, vector<8x256xf32> -> vector<8x256xf32>
      %57 = vector.broadcast %19 : vector<1x256xf32> to vector<8x256xf32>
      %58 = arith.addf %56, %57 : vector<8x256xf32>
      %cst_22 = arith.constant 0.000000e+00 : f32
      %59 = vector.broadcast %cst_22 : f32 to vector<8x256xf32>
      %60 = arith.maximumf %58, %59 : vector<8x256xf32>
      %61 = vector.shape_cast %60 : vector<8x256xf32> to vector<1x8x256xf32>
      %cst_23 = arith.constant dense<0.000000e+00> : vector<1x256xf32>
      %62 = vector.multi_reduction <add>, %61, %cst_23 [1] : vector<1x8x256xf32> to vector<1x256xf32>
      %63 = vector.shape_cast %62 : vector<1x256xf32> to vector<1x1x256xf32>
      %cst_24 = arith.constant 8.000000e+00 : f32
      %64 = vector.broadcast %cst_24 : f32 to vector<1x1x256xf32>
      %65 = arith.divf %63, %64 : vector<1x1x256xf32>
      %66 = vector.broadcast %65 : vector<1x1x256xf32> to vector<1x8x256xf32>
      %67 = arith.subf %61, %66 : vector<1x8x256xf32>
      %68 = arith.mulf %67, %67 : vector<1x8x256xf32>
      %cst_25 = arith.constant dense<0.000000e+00> : vector<1x256xf32>
      %69 = vector.multi_reduction <add>, %68, %cst_25 [1] : vector<1x8x256xf32> to vector<1x256xf32>
      %70 = vector.shape_cast %69 : vector<1x256xf32> to vector<1x1x256xf32>
      %cst_26 = arith.constant 8.000000e+00 : f32
      %71 = vector.broadcast %cst_26 : f32 to vector<1x1x256xf32>
      %72 = arith.divf %70, %71 : vector<1x1x256xf32>
      %cst_27 = arith.constant 9.99999974E-6 : f32
      %73 = vector.broadcast %cst_27 : f32 to vector<1x1x256xf32>
      %74 = arith.addf %72, %73 : vector<1x1x256xf32>
      %75 = math.rsqrt %74 : vector<1x1x256xf32>
      %76 = vector.broadcast %75 : vector<1x1x256xf32> to vector<1x8x256xf32>
      %77 = arith.mulf %67, %76 : vector<1x8x256xf32>
      %78 = vector.shape_cast %20 : vector<1x256xf32> to vector<1x1x256xf32>
      %79 = vector.broadcast %78 : vector<1x1x256xf32> to vector<1x8x256xf32>
      %80 = arith.mulf %77, %79 : vector<1x8x256xf32>
      %81 = vector.shape_cast %21 : vector<1x256xf32> to vector<1x1x256xf32>
      %82 = vector.broadcast %81 : vector<1x1x256xf32> to vector<1x8x256xf32>
      %83 = arith.addf %80, %82 : vector<1x8x256xf32>
      %84 = vector.shape_cast %83 : vector<1x8x256xf32> to vector<8x256xf32>
      %85 = arith.truncf %84 : vector<8x256xf32> to vector<8x256xbf16>
      %c0_28 = arith.constant 0 : index
      %c0_29 = arith.constant 0 : index
      %86 = vector.load %arg5[%c0_28, %c0_29] : memref<256x256xbf16, #tpu.memory_space<vmem>>, vector<256x256xbf16>
      %cst_30 = arith.constant dense<0.000000e+00> : vector<8x256xf32>
      %87 = tpu.matmul %85, %86, %cst_30 {dimension_numbers = #tpu.dot_dimension_numbers<[1], [0], [0], [1], [0, 0, 1, 1], [], []>} : vector<8x256xbf16>, vector<256x256xbf16>, vector<8x256xf32> -> vector<8x256xf32>
      %88 = vector.broadcast %22 : vector<1x256xf32> to vector<8x256xf32>
      %89 = arith.addf %87, %88 : vector<8x256xf32>
      %c0_31 = arith.constant 0 : index
      %c0_32 = arith.constant 0 : index
      %90 = vector.load %arg6[%c0_31, %c0_32] : memref<8x256xf32, #tpu.memory_space<vmem>>, vector<8x256xf32>
      tpu.vector_store %arg6[%c0_31, %c0_32], %89 {strides = array<i32>} : memref<8x256xf32, #tpu.memory_space<vmem>>, vector<8x256xf32>,
    } else {
    }
    return
  }
  func.func @transform_0(%arg0: i32) -> (i32, i32) {
    %c0_i32 = arith.constant 0 : i32
    %c0_i32_0 = arith.constant 0 : i32
    return %c0_i32, %arg0 : i32, i32
  }
  func.func @transform_1(%arg0: i32) -> (i32, i32) {
    %c0_i32 = arith.constant 0 : i32
    %c0_i32_0 = arith.constant 0 : i32
    return %arg0, %c0_i32 : i32, i32
  }
  func.func @transform_2(%arg0: i32) -> (i32, i32) {
    %c0_i32 = arith.constant 0 : i32
    %c0_i32_0 = arith.constant 0 : i32
    %c0_i32_1 = arith.constant 0 : i32
    return %c0_i32, %c0_i32_0 : i32, i32
  }
  func.func @transform_3(%arg0: i32) -> (i32, i32) {
    %c0_i32 = arith.constant 0 : i32
    %c0_i32_0 = arith.constant 0 : i32
    %c0_i32_1 = arith.constant 0 : i32
    return %c0_i32, %c0_i32_0 : i32, i32
  }
  func.func @transform_4(%arg0: i32) -> (i32, i32) {
    %c0_i32 = arith.constant 0 : i32
    %c0_i32_0 = arith.constant 0 : i32
    %c0_i32_1 = arith.constant 0 : i32
    return %c0_i32, %c0_i32_0 : i32, i32
  }
  func.func @transform_5(%arg0: i32) -> (i32, i32) {
    %c0_i32 = arith.constant 0 : i32
    %c0_i32_0 = arith.constant 0 : i32
    %c0_i32_1 = arith.constant 0 : i32
    return %c0_i32, %c0_i32_0 : i32, i32
  }
}

</mosaic_0001>

<bundles_post_ra>
// kernel: siamese_forward.1
= control target key start
LH: loop header
LB: loop body
LE: loop exit
PB: predicated region body
PF: predicated region fallthrough
CT: control target
= control target key end

     0   :  { %10 = vsyncpa [#allocation4], 0  ;;  %s2409_s0 = inlined_call_operand.vmem [shape: f32[8,768], index: 0, kind: input, shape index: {}]   ;;  %s2410_s1 = inlined_call_operand.hbm [shape: s8[768,512], index: 1, kind: input, shape index: {}]   ;;  %s2411_s2 = inlined_call_operand.vmem [shape: f32[8,512], index: 2, kind: input, shape index: {}]   ;;  %s2412_s3 = inlined_call_operand.hbm [shape: bf16[512,256], index: 3, kind: input, shape index: {}]   ;;  %s2413_s4 = inlined_call_operand.vmem [shape: bf16[256,256], index: 4, kind: input, shape index: {}]   ;;  %s2414_s5 = inlined_call_operand.hbm [shape: f32[8,256], index: 5, kind: output, shape index: {}]  }
   0x1   :  { %12 = vsyncpa [#allocation4 + $0x1], 0 }
   0x2   :  { %13 = vsyncpa [#allocation7], 0 }
   0x3   :  { %14 = vsyncpa [#allocation5], 0  ;;  %s2014_s18 = smov 0   ;;  %s2016_s19 = smov 0  }
   0x4   :  { %s2018_s20 = smov 0   ;;  %s2020_s21 = smov 0  }
   0x5 LB: > { %s2033_s22 = sadd.s32 4294967295, %s1974_s21   ;;  %p66_p0 = scmp.ne.s32.totalorder %s1966_s19, %s1962_s18  ;;  %s1974_s21 = sphi %s2020_s21, %s2431_s21   ;;  %s1970_s20 = sphi %s2018_s20, %s2430_s20   ;;  %s1966_s19 = sphi %s2016_s19, %s2429_s19   ;;  %s1962_s18 = sphi %s2014_s18, %s2428_s18  }
   0x6   : > { %p2415_p1 = scmp.eq.s32.totalorder %s2033_s22, 0  ;;  %p1508_p2 = scmp.ge.s32.totalorder %s1974_s21, 1 }
   0x7   : > { %p161_p3 = scmp.lt.s32.totalorder %s1974_s21, 4  ;;  %s1976_s25 = smov [#allocation6]  }
   0x8   : > { %p2042_p5 = por %p2415_p1, %p66_p0  ;;  %s176_s26 = sshll.u32 %s1976_s25, 4  ;;  %s177_s26 = int_to_ptr.vmem [resolvable:$true] %s176_s26 }
   0x9   : > { %p2046_p6 = pnand %p1508_p2, %p161_p3  ;;  %s2059_s28 = sadd.s32 1, %s1974_s21  }
   0xa   : > { %s2418_s23 = scalar_select %p2042_p5, 1, 0 }
   0xb   : > { %s2419_s24 = scalar_select %p2046_p6, 1, 0 }
   0xc   : > { %p1640_p7 = pneg %p2046_p6  ;;  %s53_s29 = sadd.s32 1, %s1970_s20 }
   0xd   : > { %s50_s30 = ssub.s32 %s1974_s21, %s2059_s28  ;;  %s1848_s8 = scalar_lea.hbm %s2412_s3, 8192 }
   0xe   : > { %p2054_p8 = pnand %p1640_p7, %p2415_p1  ;;  %p1849_p9 = scmp.ne.s32.totalorder %s2412_s3, %s1848_s8 }
   0xf   : > { %p1855_p13 = scmp.lt.u32.totalorder %s1848_s8, %s2412_s3 }
  0x10   : > { %p1850_p10 = pneg %p2054_p8 }
  0x12   : > { %p1851_p11 = pnand %p1850_p10, %p1849_p9 }
  0x14   : > { %p1852_p12 = pneg %p1851_p11 }
  0x16   : > { %p1857_p0 = pnand %p1855_p13, %p1852_p12 }
  0x18   : > { %1860 = shalt.err (!%p1857_p0)
}
  0x19   : > { %s1861_s13 = scalar_lea.vmem %s177_s26, 8192  ;;  %p1869_p4 = scmp.lt.s32.totalorder %s177_s26, %s177_s26 }
  0x1a   : > { %p1862_p2 = scmp.ne.s32.totalorder %s177_s26, %s1861_s13  ;;  %p1870_p1 = scmp.lt.s32.totalorder %s1861_s13, %s1861_s13 }
  0x1c   : > { %p1864_p3 = pnand %p1862_p2, %p1850_p10  ;;  %p1871_p5 = por %p1870_p1, %p1869_p4 }
  0x1e   : > { %p1865_p7 = pneg %p1864_p3 }
  0x20   : > { %p1872_p6 = pnand %p1871_p5, %p1865_p7 }
  0x22   : > { %1875 = shalt.err (!%p1872_p6)
}
  0x23   : > { %s1977_s14 = smov 128   ;;  %s1978_s15 = smov 8  }
  0x24   : > { %1643 = dma.hbm_to_vmem [thread:$0]  (!%p2054_p8), %s2412_s3, 8192, %s177_s26, [#allocation7], %s1977_s14, %s1977_s14, %s1978_s15  }
  0x25   : > { %p51_p9 = scmp.eq.s32.totalorder %s50_s30, 0  ;;  %p60_p10 = scmp.ne.s32.totalorder %s1970_s20, %s1966_s19 }
  0x26   : > { %p61_p1 = scmp.eq.s32.totalorder %s1974_s21, 0  ;;  %p1649_p4 = scmp.lt.s32.totalorder %s1974_s21, 3 }
  0x27   : > { %s2085_s18 = scalar_select %p51_p9, %s1970_s20, %s53_s29  }
  0x28   : > { %p62_p5 = por %p61_p1, %p60_p10  ;;  %s202_s25 = sand.u32 1, %s1970_s20  }
  0x29   : > { %s1511_s6 = sshll.u32 %s202_s25, 8  ;;  %s1623_s7 = sshll.u32 %s1974_s21, 12 }
  0x2a   : > { %s2092_s10 = scalar_lea.hbm %s2410_s1, %s1623_s7  ;;  %s206_s26 = scalar_lea.vmem [#allocation3], %s1511_s6 }
  0x2b   : > { %s214_s27 = sshll.u32 %s206_s26, 4  ;;  %p2096_p6 = pnand %p1649_p4, %p62_p5  ;;  %s2094_s27 = int_to_ptr.vmem [resolvable:$true] %s214_s27 }
  0x2c   : > { %s2100_s21 = scalar_lea.sflag [#allocation4], %s202_s25  ;;  %s1876_s30 = scalar_lea.hbm %s2092_s10, 4096 }
  0x2d   : > { %p1877_p8 = scmp.ne.s32.totalorder %s2092_s10, %s1876_s30  ;;  %p1878_p11 = pneg %p2096_p6 }
  0x2e   : > { %s1881_s13 = scalar_lea.hbm %s2410_s1, 12288  ;;  %p1882_p0 = scmp.lt.u32.totalorder %s2092_s10, %s2410_s1 }
  0x2f   : > { %p1879_p12 = pnand %p1878_p11, %p1877_p8  ;;  %p1883_p2 = scmp.lt.u32.totalorder %s1881_s13, %s1876_s30 }
  0x30   : > { %p1885_p7 = scmp.lt.u32.totalorder %s1876_s30, %s2092_s10 }
  0x31   : > { %p1880_p13 = pneg %p1879_p12  ;;  %p1884_p3 = por %p1883_p2, %p1882_p0 }
  0x33   : > { %p1886_p9 = por %p1885_p7, %p1884_p3 }
  0x35   : > { %p1887_p10 = pnand %p1886_p9, %p1880_p13 }
  0x37   : > { %1890 = shalt.err (!%p1887_p10)
}
  0x38   : > { %s1891_s16 = scalar_lea.vmem %s2094_s27, 4096  ;;  %s1979_s17 = smov [#allocation3]  }
  0x39   : > { %p1892_p1 = scmp.ne.s32.totalorder %s2094_s27, %s1891_s16  ;;  %s1896_s25 = sshll.u32 %s1979_s17, 4  ;;  %s1897_s25 = int_to_ptr.vmem [resolvable:$false] %s1896_s25 }
  0x3a   : > { %s1898_s6 = scalar_lea.vmem %s1897_s25, 8192  ;;  %p1899_p8 = scmp.lt.s32.totalorder %s2094_s27, %s1897_s25 }
  0x3b   : > { %p1894_p4 = pnand %p1892_p1, %p1878_p11  ;;  %p1900_p12 = scmp.lt.s32.totalorder %s1898_s6, %s1891_s16 }
  0x3d   : > { %p1895_p5 = pneg %p1894_p4  ;;  %p1901_p0 = por %p1900_p12, %p1899_p8 }
  0x3f   : > { %p1902_p2 = pnand %p1901_p0, %p1895_p5 }
  0x41   : > { %1905 = shalt.err (!%p1902_p2)
}
  0x42   : > { %s1980_s7 = smov 512   ;;  %s1981_s8 = smov 32  }
  0x43   : > { %1647 = dma.hbm_to_vmem [thread:$0]  (!%p2096_p6), %s2092_s10, 4096, %s2094_s27, %s2100_s21, %s1980_s7, %s1980_s7, %s1981_s8  }
  0x44   : > { %p2422_p11 = scmp.ne.s32.totalorder %s2419_s24, 0 }
  0x45   : > { %s228_s9 = sand.u32 (!%p2422_p11), 1, %s1966_s19   ;;  %p2423_p13 = scmp.ne.s32.totalorder (!%p2422_p11), %s2418_s23, 0 }
  0x46   : > { %226 = sbr.rel (%p2422_p11) target bundleno = 1016 (0x3f8), region = 40  ;;  %s1516_s26 = sshll.u32 (!%p2422_p11), %s228_s9, 8 }
  0x47   : > { %s229_s30 = scalar_lea.sflag (!%p2422_p11), [#allocation4], %s228_s9  ;;  %s2131_s11 = scalar_lea.vmem (!%p2422_p11), [#allocation3], %s1516_s26 }
  0x4d   : > { %1949 = dma.done.wait (%p2423_p13), %s229_s30, 4096  }
  0x4e   : > { %1951 = vsyncadd (%p2423_p13), %s229_s30, 4294963200  ;;  %p2424_p3 = scmp.eq.s32.totalorder %s2033_s22, 0 }
  0x50   : > { %1953 = dma.done.wait (%p2424_p3), [#allocation7], 8192   ;;  %p2425_p6 = pmov %p2424_p3 }
  0x51   : > { %s1518_s24 = sshll.u32 %s2033_s22, 1  ;;  %p2426_p9 = scmp.ne.s32.totalorder %s2033_s22, 0 }
  0x52   : > { %1955 = vsyncadd (%p2425_p6), [#allocation7], 4294959104  ;;  %p264_p7 = scmp.lt.s32.totalorder %s1518_s24, 5  ;;  %v1982_v0 = vmov (!%p2426_p9), 0.0  }
  0x53   : > { %273 = sbr.rel (%p2426_p9) target bundleno = 90 (0x5a), region = 52  ;;  %274 = vst [vmem:[#allocation2] sm:$0xff] (!%p2426_p9), %v1982_v0  ;;  %275 = vst [vmem:[#allocation2 + $0x8] sm:$0xff] (!%p2426_p9), %v1982_v0 }
  0x54   : > { %s2433_s24 = smov (!%p264_p7, %s1518_s24), 5  ;;  %276 = vst [vmem:[#allocation2 + $0x10] sm:$0xff] (!%p2426_p9), %v1982_v0  ;;  %277 = vst [vmem:[#allocation2 + $0x18] sm:$0xff] (!%p2426_p9), %v1982_v0 }
  0x55   : > { %s1519_s10 = sshll.u32 %s2433_s24, 3 }
  0x56   : > { %s2145_s21 = scalar_lea.vmem %s2409_s0, %s1519_s10 }
  0x5a PF: > { %v279_v1 = vld [vmem:[%s2131_s11 + $0x8] sm:$0xff]  ;;  %v281_v2 = vld [vmem:[%s2131_s11 + $0x18] sm:$0xff]  ;;  %v278_v3 = vld [vmem:[%s2131_s11] sm:$0xff]  ;;  %p1521_p10 = scmp.ne.s32.totalorder %s2033_s22, 2 }
  0x5b   : > { %v311_v4 = vunpack.c.l.s8.bf16 %v279_v1  ;;  %v315_v5 = vunpack.c.h.s8.bf16 %v279_v1  ;;  %v313_v6 = vunpack.c.l.s8.bf16 %v281_v2  ;;  %v317_v7 = vunpack.c.h.s8.bf16 %v281_v2  ;;  %v280_v8 = vld [vmem:[%s2131_s11 + $0x10] sm:$0xff]  ;;  %v283_v11 = vld [vmem:[%s2131_s11 + $0x28] sm:$0xff]  ;;  %v285_v12 = vld [vmem:[%s2131_s11 + $0x38] sm:$0xff] }
  0x5c   : > { %v310_v9 = vunpack.c.l.s8.bf16 %v278_v3  ;;  %v312_v10 = vunpack.c.l.s8.bf16 %v280_v8  ;;  %v314_v13 = vunpack.c.h.s8.bf16 %v278_v3  ;;  %v316_v14 = vunpack.c.h.s8.bf16 %v280_v8  ;;  %v282_v17 = vld [vmem:[%s2131_s11 + $0x20] sm:$0xff]  ;;  %v284_v18 = vld [vmem:[%s2131_s11 + $0x30] sm:$0xff]  ;;  %v287_v23 = vld [vmem:[%s2131_s11 + $0x48] sm:$0xff] }
  0x5d   : > { %382 = vmatprep.subr.bf16.mxu0 %v311_v4  ;;  %423 = vmatprep.subr.bf16.mxu1 %v313_v6  ;;  %v319_v15 = vunpack.c.l.s8.bf16 %v283_v11  ;;  %v321_v16 = vunpack.c.l.s8.bf16 %v285_v12  ;;  %v318_v19 = vunpack.c.l.s8.bf16 %v282_v17  ;;  %v320_v20 = vunpack.c.l.s8.bf16 %v284_v18  ;;  %v289_v24 = vld [vmem:[%s2131_s11 + $0x58] sm:$0xff]  ;;  %v286_v29 = vld [vmem:[%s2131_s11 + $0x40] sm:$0xff]  ;;  %v288_v30 = vld [vmem:[%s2131_s11 + $0x50] sm:$0xff] }
  0x5e   : > { %383 = vmatpush1.bf16.msra.mxu0 %v310_v9  ;;  %424 = vmatpush1.bf16.msra.mxu1 %v312_v10  ;;  %v323_v21 = vunpack.c.h.s8.bf16 %v283_v11  ;;  %v325_v22 = vunpack.c.h.s8.bf16 %v285_v12  ;;  %v322_v25 = vunpack.c.h.s8.bf16 %v282_v17  ;;  %v324_v26 = vunpack.c.h.s8.bf16 %v284_v18  ;;  %v379_v31 = vld [vmem:[%s2145_s21 + $0x8] sm:$0xff]  ;;  %v293_v38 = vld [vmem:[%s2131_s11 + $0x78] sm:$0xff]  ;;  %v290_v43 = vld [vmem:[%s2131_s11 + $0x60] sm:$0xff] }
  0x5f   : > { %384 = vmatprep.subr.bf16.mxu0 %v315_v5  ;;  %425 = vmatprep.subr.bf16.mxu1 %v317_v7  ;;  %v327_v27 = vunpack.c.l.s8.bf16 %v287_v23  ;;  %v329_v28 = vunpack.c.l.s8.bf16 %v289_v24  ;;  %v326_v32 = vunpack.c.l.s8.bf16 %v286_v29  ;;  %v328_v33 = vunpack.c.l.s8.bf16 %v288_v30  ;;  %v291_v37 = vld [vmem:[%s2131_s11 + $0x68] sm:$0xff]  ;;  %v292_v44 = vld [vmem:[%s2131_s11 + $0x70] sm:$0xff]  ;;  %v297_v50 = vld [vmem:[%s2131_s11 + $0x98] sm:$0xff] }
  0x60   : > { %v331_v34 = vunpack.c.h.s8.bf16 %v287_v23  ;;  %v333_v35 = vunpack.c.h.s8.bf16 %v289_v24  ;;  %v381_v36 = vpack.c.bf16 %v379_v31, %v379_v31  ;;  %v330_v39 = vunpack.c.h.s8.bf16 %v286_v29  ;;  %v295_v49 = vld [vmem:[%s2131_s11 + $0x88] sm:$0xff]  ;;  %v294_v55 = vld [vmem:[%s2131_s11 + $0x80] sm:$0xff]  ;;  %v296_v56 = vld [vmem:[%s2131_s11 + $0x90] sm:$0xff] }
  0x61   : > { %v332_v40 = vunpack.c.h.s8.bf16 %v288_v30  ;;  %v335_v41 = vunpack.c.l.s8.bf16 %v291_v37  ;;  %v337_v42 = vunpack.c.l.s8.bf16 %v293_v38  ;;  %v334_v45 = vunpack.c.l.s8.bf16 %v290_v43  ;;  %v299_v61 = vld [vmem:[%s2131_s11 + $0xa8] sm:$0xff]  ;;  %v301_v62 = vld [vmem:[%s2131_s11 + $0xb8] sm:$0xff]  ;;  %v298_v3 = vld [vmem:[%s2131_s11 + $0xa0] sm:$0xff] }
  0x62   : > { %385 = vmatpush1.bf16.msra.mxu0 %v314_v13  ;;  %426 = vmatpush1.bf16.msra.mxu1 %v316_v14  ;;  %v336_v46 = vunpack.c.l.s8.bf16 %v292_v44  ;;  %v339_v47 = vunpack.c.h.s8.bf16 %v291_v37  ;;  %v341_v48 = vunpack.c.h.s8.bf16 %v293_v38  ;;  %v338_v51 = vunpack.c.h.s8.bf16 %v290_v43  ;;  %v300_v4 = vld [vmem:[%s2131_s11 + $0xb0] sm:$0xff]  ;;  %v303_v9 = vld [vmem:[%s2131_s11 + $0xc8] sm:$0xff]  ;;  %v305_v10 = vld [vmem:[%s2131_s11 + $0xd8] sm:$0xff] }
  0x63   : > { %386 = vmatprep.subr.bf16.mxu0 %v319_v15  ;;  %427 = vmatprep.subr.bf16.mxu1 %v321_v16  ;;  %v340_v52 = vunpack.c.h.s8.bf16 %v292_v44  ;;  %v343_v53 = vunpack.c.l.s8.bf16 %v295_v49  ;;  %v345_v54 = vunpack.c.l.s8.bf16 %v297_v50  ;;  %v342_v57 = vunpack.c.l.s8.bf16 %v294_v55  ;;  %v302_v15 = vld [vmem:[%s2131_s11 + $0xc0] sm:$0xff]  ;;  %v304_v16 = vld [vmem:[%s2131_s11 + $0xd0] sm:$0xff] }
  0x64   : > { %414 = vmatprep.mubr.bf16.mxu0 %v381_v36  ;;  %455 = vmatprep.mubr.bf16.mxu1 %v381_v36  ;;  %v344_v58 = vunpack.c.l.s8.bf16 %v296_v56  ;;  %v347_v59 = vunpack.c.h.s8.bf16 %v295_v49  ;;  %v349_v60 = vunpack.c.h.s8.bf16 %v297_v50  ;;  %v346_v63 = vunpack.c.h.s8.bf16 %v294_v55  ;;  %v374_v37 = vld [vmem:[#allocation2] sm:$0xff]  ;;  %v376_v38 = vld [vmem:[#allocation2 + $0x10] sm:$0xff] }
  0x65   : > { %v348_v0 = vunpack.c.h.s8.bf16 %v296_v56  ;;  %v351_v1 = vunpack.c.l.s8.bf16 %v299_v61  ;;  %v353_v2 = vunpack.c.l.s8.bf16 %v301_v62  ;;  %v350_v5 = vunpack.c.l.s8.bf16 %v298_v3  ;;  %v1695_v55 = vld [vmem:[#allocation6 + $0x14] ss:$8 sps:$4 sm:$0xff] (!%p1521_p10)   ;;  %v1697_v56 = vld [vmem:[#allocation6 + $0x10] ss:$8 sps:$4 sm:$0xff] (!%p1521_p10)  }
  0x66   : > { %387 = vmatpush1.bf16.msra.mxu0 %v318_v19  ;;  %428 = vmatpush1.bf16.msra.mxu1 %v320_v20  ;;  %v352_v6 = vunpack.c.l.s8.bf16 %v300_v4  ;;  %v355_v7 = vunpack.c.h.s8.bf16 %v299_v61  ;;  %v357_v8 = vunpack.c.h.s8.bf16 %v301_v62  ;;  %v354_v11 = vunpack.c.h.s8.bf16 %v298_v3  ;;  %v1703_v61 = vld [vmem:[#allocation6 + $0x30] ss:$8 sps:$4 sm:$0xff] (!%p1521_p10)   ;;  %v1704_v62 = vld [vmem:[#allocation6 + $0x44] ss:$8 sps:$4 sm:$0xff] (!%p1521_p10)  }
  0x67   : > { %388 = vmatprep.subr.bf16.mxu0 %v323_v21  ;;  %429 = vmatprep.subr.bf16.mxu1 %v325_v22  ;;  %v356_v12 = vunpack.c.h.s8.bf16 %v300_v4  ;;  %v359_v13 = vunpack.c.l.s8.bf16 %v303_v9  ;;  %v361_v14 = vunpack.c.l.s8.bf16 %v305_v10  ;;  %v358_v17 = vunpack.c.l.s8.bf16 %v302_v15  ;;  %v307_v21 = vld [vmem:[%s2131_s11 + $0xe8] sm:$0xff]  ;;  %v309_v22 = vld [vmem:[%s2131_s11 + $0xf8] sm:$0xff] }
  0x68   : > { %v360_v18 = vunpack.c.l.s8.bf16 %v304_v16  ;;  %v363_v19 = vunpack.c.h.s8.bf16 %v303_v9  ;;  %v365_v20 = vunpack.c.h.s8.bf16 %v305_v10  ;;  %v362_v23 = vunpack.c.h.s8.bf16 %v302_v15  ;;  %v1709_v4 = vld [vmem:[#allocation6 + $0x50] ss:$8 sps:$4 sm:$0xff] (!%p1521_p10)   ;;  %v1712_v10 = vld [vmem:[#allocation6 + $0x60] ss:$8 sps:$4 sm:$0xff] (!%p1521_p10)  }
  0x69   : > { %v364_v24 = vunpack.c.h.s8.bf16 %v304_v16  ;;  %v371_v31 = vunpack.c.h.s8.bf16 %v307_v21 }
  0x6a   : > { %389 = vmatpush1.bf16.msra.mxu0 %v322_v25  ;;  %430 = vmatpush1.bf16.msra.mxu1 %v324_v26  ;;  %v367_v25 = vunpack.c.l.s8.bf16 %v307_v21  ;;  %v369_v26 = vunpack.c.l.s8.bf16 %v309_v22 }
  0x6b   : > { %390 = vmatprep.subr.bf16.mxu0 %v327_v27  ;;  %431 = vmatprep.subr.bf16.mxu1 %v329_v28  ;;  %v306_v27 = vld [vmem:[%s2131_s11 + $0xe0] sm:$0xff]  ;;  %v308_v28 = vld [vmem:[%s2131_s11 + $0xf0] sm:$0xff] }
  0x6c   : > { %v366_v29 = vunpack.c.l.s8.bf16 %v306_v27  ;;  %v368_v30 = vunpack.c.l.s8.bf16 %v308_v28 }
  0x6e   : > { %391 = vmatpush1.bf16.msra.mxu0 %v326_v32  ;;  %432 = vmatpush1.bf16.msra.mxu1 %v328_v33  ;;  %v373_v32 = vunpack.c.h.s8.bf16 %v309_v22  ;;  %v370_v33 = vunpack.c.h.s8.bf16 %v306_v27 }
  0x6f   : > { %392 = vmatprep.subr.bf16.mxu0 %v331_v34  ;;  %433 = vmatprep.subr.bf16.mxu1 %v333_v35  ;;  %v372_v34 = vunpack.c.h.s8.bf16 %v308_v28  ;;  %v378_v35 = vld [vmem:[%s2145_s21] sm:$0xff] }
  0x70   : > { %v380_v36 = vpack.c.bf16 %v378_v35, %v378_v35 }
  0x72   : > { %393 = vmatpush1.bf16.msra.mxu0 %v330_v39  ;;  %434 = vmatpush1.bf16.msra.mxu1 %v332_v40  ;;  %v375_v39 = vld [vmem:[#allocation2 + $0x8] sm:$0xff]  ;;  %v377_v40 = vld [vmem:[#allocation2 + $0x18] sm:$0xff] }
  0x73   : > { %394 = vmatprep.subr.bf16.mxu0 %v335_v41  ;;  %435 = vmatprep.subr.bf16.mxu1 %v337_v42 }
  0x76   : > { %395 = vmatpush1.bf16.msra.mxu0 %v334_v45  ;;  %436 = vmatpush1.bf16.msra.mxu1 %v336_v46 }
  0x77   : > { %396 = vmatprep.subr.bf16.mxu0 %v339_v47  ;;  %437 = vmatprep.subr.bf16.mxu1 %v341_v48 }
  0x7a   : > { %397 = vmatpush1.bf16.msra.mxu0 %v338_v51  ;;  %438 = vmatpush1.bf16.msra.mxu1 %v340_v52 }
  0x7b   : > { %398 = vmatprep.subr.bf16.mxu0 %v343_v53  ;;  %439 = vmatprep.subr.bf16.mxu1 %v345_v54  ;;  %v1692_v53 = vld [vmem:[#allocation6 + $0x4] ss:$8 sps:$4 sm:$0xff] (!%p1521_p10)   ;;  %v1694_v54 = vld [vmem:[#allocation6] ss:$8 sps:$4 sm:$0xff] (!%p1521_p10)  }
  0x7e   : > { %399 = vmatpush1.bf16.msra.mxu0 %v342_v57  ;;  %440 = vmatpush1.bf16.msra.mxu1 %v344_v58  ;;  %v1698_v57 = vld [vmem:[#allocation6 + $0x24] ss:$8 sps:$4 sm:$0xff] (!%p1521_p10)   ;;  %v1700_v58 = vld [vmem:[#allocation6 + $0x20] ss:$8 sps:$4 sm:$0xff] (!%p1521_p10)  }
  0x7f   : > { %400 = vmatprep.subr.bf16.mxu0 %v347_v59  ;;  %441 = vmatprep.subr.bf16.mxu1 %v349_v60  ;;  %v1701_v59 = vld [vmem:[#allocation6 + $0x34] ss:$8 sps:$4 sm:$0xff] (!%p1521_p10)   ;;  %v484_v60 = vlaneseq (!%p1521_p10) }
  0x82   : > { %401 = vmatpush1.bf16.msra.mxu0 %v346_v63  ;;  %442 = vmatpush1.bf16.msra.mxu1 %v348_v0  ;;  %v2184_v63 = vshrl.u32 (!%p1521_p10), %v484_v60, 7  ;;  %v1706_v0 = vld [vmem:[#allocation6 + $0x40] ss:$8 sps:$4 sm:$0xff] (!%p1521_p10)  }
  0x83   : > { %402 = vmatprep.subr.bf16.mxu0 %v351_v1  ;;  %443 = vmatprep.subr.bf16.mxu1 %v353_v2  ;;  %v1707_v1 = vld [vmem:[#allocation6 + $0x54] ss:$8 sps:$4 sm:$0xff] (!%p1521_p10)   ;;  %v1790_v60 = vld [vmem:[%s2413_s4] ss:$8 sps:$4 sm:$0xff] (!%p1521_p10)  }
  0x84   : > { %v2187_v2 = vsub.s32 (!%p1521_p10), 3, %v2184_v63  ;;  %v2190_v3 = vsub.s32 (!%p1521_p10), 0, %v2184_v63 }
  0x86   : > { %403 = vmatpush1.bf16.msra.mxu0 %v350_v5  ;;  %444 = vmatpush1.bf16.msra.mxu1 %v352_v6  ;;  %v1710_v5 = vld [vmem:[#allocation6 + $0x64] ss:$8 sps:$4 sm:$0xff] (!%p1521_p10)  }
  0x87   : > { %404 = vmatprep.subr.bf16.mxu0 %v355_v7  ;;  %445 = vmatprep.subr.bf16.mxu1 %v357_v8  ;;  %v2195_v6 = vld [vmem:[%s2411_s2 + $0x8] sm:$0xff] (!%p1521_p10) }
  0x88   : > { %v491_v8 = vrot.slane (!%p1521_p10), %v2195_v6, %v2187_v2  ;;  %v511_v9 = vrot.slane (!%p1521_p10), %v2195_v6, %v2190_v3 }
  0x8a   : > { %405 = vmatpush1.bf16.msra.mxu0 %v354_v11  ;;  %446 = vmatpush1.bf16.msra.mxu1 %v356_v12  ;;  %v2204_v11 = vld [vmem:[%s2411_s2] sm:$0xff] (!%p1521_p10) }
  0x8b   : > { %406 = vmatprep.subr.bf16.mxu0 %v359_v13  ;;  %447 = vmatprep.subr.bf16.mxu1 %v361_v14  ;;  %v1713_v13 = vld [vmem:[#allocation6 + $0x74] ss:$8 sps:$4 sm:$0xff] (!%p1521_p10)   ;;  %v487_v15 = vrot.slane (!%p1521_p10), %v2204_v11, %v2187_v2  ;;  %v507_v16 = vrot.slane (!%p1521_p10), %v2204_v11, %v2190_v3 }
  0x8e   : > { %407 = vmatpush1.bf16.msra.mxu0 %v358_v17  ;;  %448 = vmatpush1.bf16.msra.mxu1 %v360_v18 }
  0x8f   : > { %408 = vmatprep.subr.bf16.mxu0 %v363_v19  ;;  %449 = vmatprep.subr.bf16.mxu1 %v365_v20  ;;  %v1715_v19 = vld [vmem:[#allocation6 + $0x70] ss:$8 sps:$4 sm:$0xff] (!%p1521_p10)   ;;  %v1716_v20 = vld [vmem:[#allocation6 + $0x84] ss:$8 sps:$4 sm:$0xff] (!%p1521_p10)  }
  0x92   : > { %409 = vmatpush1.bf16.msra.mxu0 %v362_v23  ;;  %450 = vmatpush1.bf16.msra.mxu1 %v364_v24 }
  0x93   : > { %410 = vmatprep.subr.bf16.mxu0 %v367_v25  ;;  %451 = vmatprep.subr.bf16.mxu1 %v369_v26  ;;  %v1718_v25 = vld [vmem:[#allocation6 + $0x80] ss:$8 sps:$4 sm:$0xff] (!%p1521_p10)   ;;  %v1719_v26 = vld [vmem:[#allocation6 + $0x94] ss:$8 sps:$4 sm:$0xff] (!%p1521_p10)  }
  0x96   : > { %411 = vmatpush1.bf16.msra.mxu0 %v366_v29  ;;  %452 = vmatpush1.bf16.msra.mxu1 %v368_v30 }
  0x97   : > { %412 = vmatprep.subr.bf16.mxu0 %v371_v31  ;;  %453 = vmatprep.subr.bf16.mxu1 %v373_v32  ;;  %v1721_v31 = vld [vmem:[#allocation6 + $0x90] ss:$8 sps:$4 sm:$0xff] (!%p1521_p10)   ;;  %v1722_v32 = vld [vmem:[#allocation6 + $0xa4] ss:$8 sps:$4 sm:$0xff] (!%p1521_p10)  }
  0x9a   : > { %413 = vmatpush1.bf16.msra.mxu0 %v370_v33  ;;  %454 = vmatpush1.bf16.msra.mxu1 %v372_v34 }
  0x9b   : > { %1041 = vmatprep.subr.bf16.mxu0 (!%p1521_p10), %v1692_v53 }
  0x9d   : > { %415 = vmatmul.mubr.bf16.vlgmr.msra.gmra.mrb[0].mxu0 %v380_v36  ;;  %456 = vmatmul.mubr.bf16.vlgmr.msra.gmra.mrb[0].mxu1 %v380_v36 }
  0x9e   : > { %1042 = vmatpush1.bf16.msra.mxu0 (!%p1521_p10), %v1694_v54  ;;  %v1731_v54 = vld [vmem:[#allocation6 + $0xd4] ss:$8 sps:$4 sm:$0xff] (!%p1521_p10)  }
  0x9f   : > { %1043 = vmatprep.subr.bf16.mxu0 (!%p1521_p10), %v1695_v55 }
  0xa2   : > { %1044 = vmatpush1.bf16.msra.mxu0 (!%p1521_p10), %v1697_v56 }
  0xa3   : > { %1045 = vmatprep.subr.bf16.mxu0 (!%p1521_p10), %v1698_v57 }
  0xa6   : > { %1046 = vmatpush1.bf16.msra.mxu0 (!%p1521_p10), %v1700_v58 }
  0xa7   : > { %1047 = vmatprep.subr.bf16.mxu0 (!%p1521_p10), %v1701_v59  ;;  %v1788_v59 = vld [vmem:[%s2413_s4 + $0x4] ss:$8 sps:$4 sm:$0xff] (!%p1521_p10)  }
  0xa8   : > { %1385 = vmatprep.subr.bf16.mxu1 (!%p1521_p10), %v1788_v59 }
  0xa9   : > { %1386 = vmatpush1.bf16.msra.mxu1 (!%p1521_p10), %v1790_v60 }
  0xaa   : > { %1048 = vmatpush1.bf16.msra.mxu0 (!%p1521_p10), %v1703_v61 }
  0xab   : > { %1049 = vmatprep.subr.bf16.mxu0 (!%p1521_p10), %v1704_v62 }
  0xae   : > { %1050 = vmatpush1.bf16.msra.mxu0 (!%p1521_p10), %v1706_v0 }
  0xaf   : > { %1051 = vmatprep.subr.bf16.mxu0 (!%p1521_p10), %v1707_v1 }
  0xb2   : > { %1052 = vmatpush1.bf16.msra.mxu0 (!%p1521_p10), %v1709_v4 }
  0xb3   : > { %1053 = vmatprep.subr.bf16.mxu0 (!%p1521_p10), %v1710_v5 }
  0xb6   : > { %1054 = vmatpush1.bf16.msra.mxu0 (!%p1521_p10), %v1712_v10 }
  0xb7   : > { %1055 = vmatprep.subr.bf16.mxu0 (!%p1521_p10), %v1713_v13 }
  0xba   : > { %1056 = vmatpush1.bf16.msra.mxu0 (!%p1521_p10), %v1715_v19 }
  0xbb   : > { %1057 = vmatprep.subr.bf16.mxu0 (!%p1521_p10), %v1716_v20 }
  0xbe   : > { %1058 = vmatpush1.bf16.msra.mxu0 (!%p1521_p10), %v1718_v25 }
  0xbf   : > { %1059 = vmatprep.subr.bf16.mxu0 (!%p1521_p10), %v1719_v26 }
  0xc2   : > { %1060 = vmatpush1.bf16.msra.mxu0 (!%p1521_p10), %v1721_v31  ;;  %v1742_v31 = vld [vmem:[#allocation6 + $0x104] ss:$8 sps:$4 sm:$0xff] (!%p1521_p10)  }
  0xc3   : > { %1061 = vmatprep.subr.bf16.mxu0 (!%p1521_p10), %v1722_v32 }
 0x16e   : > { %475 = sbr.rel (%p1521_p10) target bundleno = 991 (0x3df), region = 56 }
 0x170   : > { %v416_v41 = vpop.f32.mrb[0].mxu0  ;;  %v457_v42 = vpop.f32.mrb[0].mxu1 }
 0x171   : > { %v464_v43 = vadd.f32 %v416_v41, %v374_v37  ;;  %v466_v44 = vadd.f32 %v457_v42, %v376_v38  ;;  %v418_v45 = vpop.f32.mrb[1].mxu0  ;;  %v459_v46 = vpop.f32.mrb[1].mxu1  ;;  %v1724_v37 = vld [vmem:[#allocation6 + $0xa0] ss:$8 sps:$4 sm:$0xff] (!%p1521_p10)   ;;  %v1725_v38 = vld [vmem:[#allocation6 + $0xb4] ss:$8 sps:$4 sm:$0xff] (!%p1521_p10)  }
 0x172   : > { %v465_v47 = vadd.f32 %v418_v45, %v375_v39  ;;  %v467_v48 = vadd.f32 %v459_v46, %v377_v40  ;;  %v420_v49 = vpop.f32.mrb[2].mxu0  ;;  %v461_v50 = vpop.f32.mrb[2].mxu1  ;;  %1062 = vmatpush1.bf16.msra.mxu0 (!%p1521_p10), %v1724_v37 }
 0x173   : > { %468 = vst [vmem:[#allocation2] sm:$0xff] %v464_v43  ;;  %470 = vst [vmem:[#allocation2 + $0x10] sm:$0xff] %v466_v44  ;;  %v421_v51 = vpop.f32.mrb[3].mxu0  ;;  %v462_v52 = vpop.f32.mrb[3].mxu1  ;;  %v1727_v43 = vld [vmem:[#allocation6 + $0xb0] ss:$8 sps:$4 sm:$0xff] (!%p1521_p10)   ;;  %1063 = vmatprep.subr.bf16.mxu0 (!%p1521_p10), %v1725_v38 }
 0x174   : > { %469 = vst [vmem:[#allocation2 + $0x8] sm:$0xff] %v465_v47  ;;  %471 = vst [vmem:[#allocation2 + $0x18] sm:$0xff] %v467_v48  ;;  %v1728_v44 = vld [vmem:[#allocation6 + $0xc4] ss:$8 sps:$4 sm:$0xff] (!%p1521_p10)   ;;  %v2215_v47 = vld [vmem:[%s2411_s2 + $0x18] sm:$0xff] (!%p1521_p10) }
 0x175   : > { %v1730_v49 = vld [vmem:[#allocation6 + $0xc0] ss:$8 sps:$4 sm:$0xff]   ;;  %v499_v50 = vrot.slane %v2215_v47, %v2187_v2  ;;  %v519_v51 = vrot.slane %v2215_v47, %v2190_v3  ;;  %v2224_v52 = vld [vmem:[%s2411_s2 + $0x10] sm:$0xff] }
 0x176   : > { %v495_v57 = vrot.slane %v2224_v52, %v2187_v2  ;;  %v515_v58 = vrot.slane %v2224_v52, %v2190_v3  ;;  %1064 = vmatpush1.bf16.msra.mxu0 %v1727_v43  ;;  %v1733_v2 = vld [vmem:[#allocation6 + $0xd0] ss:$8 sps:$4 sm:$0xff]   ;;  %v1734_v3 = vld [vmem:[#allocation6 + $0xe4] ss:$8 sps:$4 sm:$0xff]  }
 0x177   : > { %1065 = vmatprep.subr.bf16.mxu0 %v1728_v44 }
 0x17a   : > { %v480_v12 = vld [vmem:[#allocation2] sm:$0xff]  ;;  %v482_v53 = vld [vmem:[#allocation2 + $0x10] sm:$0xff]  ;;  %1066 = vmatpush1.bf16.msra.mxu0 %v1730_v49 }
 0x17b   : > { %v481_v7 = vld [vmem:[#allocation2 + $0x8] sm:$0xff]  ;;  %v500_v18 = vmul.f32 %v487_v15, %v480_v12  ;;  %v483_v48 = vld [vmem:[#allocation2 + $0x18] sm:$0xff]  ;;  %v502_v1 = vmul.f32 %v495_v57, %v482_v53  ;;  %1067 = vmatprep.subr.bf16.mxu0 %v1731_v54 }
 0x17c   : > { %v501_v14 = vmul.f32 %v491_v8, %v481_v7  ;;  %v503_v61 = vmul.f32 %v499_v50, %v483_v48  ;;  %v2250_v50 = vsub.s32 2, %v2184_v63 }
 0x17d   : > { %v520_v22 = vadd.f32 %v507_v16, %v500_v18  ;;  %v522_v8 = vadd.f32 %v515_v58, %v502_v1  ;;  %v1737_v16 = vld [vmem:[#allocation6 + $0xf4] ss:$8 sps:$4 sm:$0xff]  }
 0x17e   : > { %v521_v17 = vadd.f32 %v511_v9, %v501_v14  ;;  %v523_v4 = vadd.f32 %v519_v51, %v503_v61  ;;  %v1736_v14 = vld [vmem:[#allocation6 + $0xe0] ss:$8 sps:$4 sm:$0xff]   ;;  %1068 = vmatpush1.bf16.msra.mxu0 %v1733_v2  ;;  %v632_v60 = vrot.slane %v2195_v6, %v2250_v50 }
 0x17f   : > { %v524_v24 = vmax.f32 %v520_v22, 0.0  ;;  %v526_v13 = vmax.f32 %v522_v8, 0.0  ;;  %1069 = vmatprep.subr.bf16.mxu0 %v1734_v3  ;;  %v628_v3 = vrot.slane %v2204_v11, %v2250_v50 }
 0x180   : > { %v525_v21 = vmax.f32 %v521_v17, 0.0  ;;  %v527_v9 = vmax.f32 %v523_v4, 0.0 }
 0x181   : > { %v528_v28 = vrot.slane %v524_v24, 4  ;;  %v540_v19 = vrot.slane %v526_v13, 4 }
 0x182   : > { %v534_v23 = vrot.slane %v525_v21, 4  ;;  %v546_v15 = vrot.slane %v527_v9, 4  ;;  %1070 = vmatpush1.bf16.msra.mxu0 %v1736_v14 }
 0x183   : > { %v529_v30 = vadd.f32 %v528_v28, %v524_v24  ;;  %v1739_v28 = vld [vmem:[#allocation6 + $0xf0] ss:$8 sps:$4 sm:$0xff]   ;;  %1071 = vmatprep.subr.bf16.mxu0 %v1737_v16 }
 0x184   : > { %v535_v27 = vadd.f32 %v534_v23, %v525_v21  ;;  %v547_v20 = vadd.f32 %v546_v15, %v527_v9  ;;  %v541_v23 = vadd.f32 %v540_v19, %v526_v13  ;;  %v1740_v15 = vld [vmem:[#allocation6 + $0x100] ss:$8 sps:$4 sm:$0xff]  }
 0x185   : > { %v530_v34 = vrot.slane %v529_v30, 2 }
 0x186   : > { %v536_v29 = vrot.slane %v535_v27, 2  ;;  %1072 = vmatpush1.bf16.msra.mxu0 %v1739_v28 }
 0x187   : > { %v531_v36 = vadd.f32 %v530_v34, %v529_v30  ;;  %1082 = vmatprep.subr.bf16.mxu0 %v1742_v31 }
 0x188   : > { %v537_v33 = vadd.f32 %v536_v29, %v535_v27  ;;  %v542_v27 = vrot.slane %v541_v23, 2 }
 0x189   : > { %v532_v40 = vrot.slane %v531_v36, 1 }
 0x18a   : > { %v538_v35 = vrot.slane %v537_v33, 1 }
 0x18b   : > { %v533_v42 = vadd.f32 %v532_v40, %v531_v36 }
 0x18c   : > { %v539_v39 = vadd.f32 %v538_v35, %v537_v33  ;;  %v543_v33 = vadd.f32 %v542_v27, %v541_v23  ;;  %v1748_v23 = vld [vmem:[#allocation6 + $0x124] ss:$8 sps:$4 sm:$0xff]  }
 0x18d   : > { %v553_v46 = vmul.f32 0.125, %v533_v42  ;;  %v1754_v27 = vld [vmem:[#allocation6 + $0x144] ss:$8 sps:$4 sm:$0xff]  }
 0x18e   : > { %v554_v41 = vmul.f32 0.125, %v539_v39  ;;  %v544_v37 = vrot.slane %v543_v33, 1 }
 0x18f   : > { %v2228_v56 = vsub.f32 %v524_v24, %v553_v46  ;;  %v548_v24 = vrot.slane %v547_v20, 2  ;;  %v2245_v46 = vsub.s32 1, %v2184_v63 }
 0x190   : > { %v2210_v45 = vsub.f32 %v525_v21, %v554_v41  ;;  %v545_v40 = vadd.f32 %v544_v37, %v543_v33  ;;  %v636_v37 = vrot.slane %v2224_v52, %v2250_v50 }
 0x191   : > { %v561_v0 = vmul.f32 %v2228_v56, %v2228_v56  ;;  %v549_v29 = vadd.f32 %v548_v24, %v547_v20  ;;  %v612_v54 = vrot.slane %v2195_v6, %v2245_v46  ;;  %v608_v61 = vrot.slane %v2204_v11, %v2245_v46  ;;  %v1746_v24 = vld [vmem:[#allocation6 + $0x120] ss:$8 sps:$4 sm:$0xff]  }
 0x192   : > { %v562_v55 = vmul.f32 %v2210_v45, %v2210_v45  ;;  %v555_v42 = vmul.f32 0.125, %v545_v40  ;;  %v620_v28 = vrot.slane %v2215_v47, %v2245_v46  ;;  %v1755_v40 = vld [vmem:[#allocation6 + $0x150] ss:$8 sps:$4 sm:$0xff]  }
 0x193   : > { %v565_v7 = vrot.slane %v561_v0, 4  ;;  %v550_v34 = vrot.slane %v549_v29, 1 }
 0x194   : > { %v571_v62 = vrot.slane %v562_v55, 4  ;;  %v2242_v44 = vsub.f32 %v526_v13, %v555_v42  ;;  %v1760_v42 = vld [vmem:[#allocation6 + $0x164] ss:$8 sps:$4 sm:$0xff]  }
 0x195   : > { %v566_v12 = vadd.f32 %v565_v7, %v561_v0  ;;  %v551_v38 = vadd.f32 %v550_v34, %v549_v29  ;;  %v640_v34 = vrot.slane %v2215_v47, %v2250_v50  ;;  %v1763_v47 = vld [vmem:[#allocation6 + $0x174] ss:$8 sps:$4 sm:$0xff]  }
 0x196   : > { %v572_v5 = vadd.f32 %v571_v62, %v562_v55  ;;  %v563_v49 = vmul.f32 %v2242_v44, %v2242_v44  ;;  %v1769_v50 = vld [vmem:[#allocation6 + $0x194] ss:$8 sps:$4 sm:$0xff]  }
 0x197   : > { %v567_v18 = vrot.slane %v566_v12, 2  ;;  %v556_v41 = vmul.f32 0.125, %v551_v38 }
 0x198   : > { %v573_v10 = vrot.slane %v572_v5, 2  ;;  %v577_v53 = vrot.slane %v563_v49, 4 }
 0x199   : > { %v568_v22 = vadd.f32 %v567_v18, %v566_v12  ;;  %v560_v43 = vsub.f32 %v527_v9, %v556_v41  ;;  %v1745_v18 = vld [vmem:[#allocation6 + $0x114] ss:$8 sps:$4 sm:$0xff]  }
 0x19a   : > { %v574_v17 = vadd.f32 %v573_v10, %v572_v5  ;;  %v578_v58 = vadd.f32 %v577_v53, %v563_v49  ;;  %v1761_v49 = vld [vmem:[#allocation6 + $0x170] ss:$8 sps:$4 sm:$0xff]   ;;  %v1772_v53 = vld [vmem:[#allocation6 + $0x1a4] ss:$8 sps:$4 sm:$0xff]  }
 0x19b   : > { %v569_v26 = vrot.slane %v568_v22, 1  ;;  %v564_v48 = vmul.f32 %v560_v43, %v560_v43 }
 0x19c   : > { %v575_v21 = vrot.slane %v574_v17, 1  ;;  %v579_v1 = vrot.slane %v578_v58, 2 }
 0x19d   : > { %v570_v32 = vadd.f32 %v569_v26, %v568_v22  ;;  %v583_v51 = vrot.slane %v564_v48, 4  ;;  %v1749_v26 = vld [vmem:[#allocation6 + $0x130] ss:$8 sps:$4 sm:$0xff]  }
 0x19e   : > { %v576_v25 = vadd.f32 %v575_v21, %v574_v17  ;;  %v580_v7 = vadd.f32 %v579_v1, %v578_v58  ;;  %v1743_v21 = vld [vmem:[#allocation6 + $0x110] ss:$8 sps:$4 sm:$0xff]   ;;  %v1778_v58 = vld [vmem:[#allocation6 + $0x1c4] ss:$8 sps:$4 sm:$0xff]   ;;  %v1787_v1 = vld [vmem:[#allocation6 + $0x1f4] ss:$8 sps:$4 sm:$0xff]  }
 0x19f   : > { %v589_v36 = vmul.f32 0.125, %v570_v32  ;;  %v584_v55 = vadd.f32 %v583_v51, %v564_v48  ;;  %v1752_v32 = vld [vmem:[#allocation6 + $0x140] ss:$8 sps:$4 sm:$0xff]   ;;  %v1767_v51 = vld [vmem:[#allocation6 + $0x190] ss:$8 sps:$4 sm:$0xff]  }
 0x1a0   : > { %v590_v30 = vmul.f32 0.125, %v576_v25  ;;  %v581_v10 = vrot.slane %v580_v7, 1  ;;  %v1751_v25 = vld [vmem:[#allocation6 + $0x134] ss:$8 sps:$4 sm:$0xff]  }
 0x1a1   : > { %v593_v39 = vadd.f32 1e-05, %v589_v36  ;;  %v585_v62 = vrot.slane %v584_v55, 2 }
 0x1a2   : > { %v594_v35 = vadd.f32 1e-05, %v590_v30  ;;  %v582_v16 = vadd.f32 %v581_v10, %v580_v7  ;;  %v616_v30 = vrot.slane %v2224_v52, %v2245_v46  ;;  %v1764_v52 = vld [vmem:[#allocation6 + $0x180] ss:$8 sps:$4 sm:$0xff]   ;;  %v1794_v7 = vld [vmem:[%s2413_s4 + $0x24] ss:$8 sps:$4 sm:$0xff]  }
 0x1a3   : > { %v586_v5 = vadd.f32 %v585_v62, %v584_v55  ;;  %v1775_v55 = vld [vmem:[#allocation6 + $0x1b4] ss:$8 sps:$4 sm:$0xff]   ;;  %v1784_v62 = vld [vmem:[#allocation6 + $0x1e4] ss:$8 sps:$4 sm:$0xff]  }
 0x1a4   : > { %1836 = vrsqrt.f32 %v594_v35  ;;  %v591_v20 = vmul.f32 0.125, %v582_v16  ;;  %v1757_v35 = vld [vmem:[#allocation6 + $0x154] ss:$8 sps:$4 sm:$0xff]   ;;  %v1800_v10 = vld [vmem:[%s2413_s4 + $0x44] ss:$8 sps:$4 sm:$0xff]  }
 0x1a5   : > { %1838 = vrsqrt.f32 %v593_v39  ;;  %v1808_v16 = vld [vmem:[%s2413_s4 + $0x60] ss:$8 sps:$4 sm:$0xff]  }
 0x1a6   : > { %v595_v22 = vadd.f32 1e-05, %v591_v20  ;;  %v1814_v20 = vld [vmem:[%s2413_s4 + $0x80] ss:$8 sps:$4 sm:$0xff]  }
 0x1ae   : > { %v1837_v57 = vpop.eup %1836 }
 0x1af   : > { %v602_v59 = vmul.f32 %v1837_v57, %v2210_v45  ;;  %v1839_v0 = vpop.eup %1838  ;;  %v587_v45 = vrot.slane %v586_v5, 1  ;;  %v1773_v57 = vld [vmem:[#allocation6 + $0x1b0] ss:$8 sps:$4 sm:$0xff]  }
 0x1b0   : > { %v601_v4 = vmul.f32 %v1839_v0, %v2228_v56  ;;  %v1782_v0 = vld [vmem:[#allocation6 + $0x1e0] ss:$8 sps:$4 sm:$0xff]  }
 0x1b1   : > { %v622_v2 = vmul.f32 %v612_v54, %v602_v59  ;;  %v588_v14 = vadd.f32 %v587_v45, %v586_v5  ;;  %v1770_v54 = vld [vmem:[#allocation6 + $0x1a0] ss:$8 sps:$4 sm:$0xff]   ;;  %v1793_v5 = vld [vmem:[%s2413_s4 + $0x10] ss:$8 sps:$4 sm:$0xff]  }
 0x1b2   : > { %v621_v9 = vmul.f32 %v608_v61, %v601_v4  ;;  %v1776_v59 = vld [vmem:[#allocation6 + $0x1c0] ss:$8 sps:$4 sm:$0xff]   ;;  %v1779_v61 = vld [vmem:[#allocation6 + $0x1d0] ss:$8 sps:$4 sm:$0xff]  }
 0x1b3   : > { %v642_v8 = vadd.f32 %v632_v60, %v622_v2  ;;  %v592_v19 = vmul.f32 0.125, %v588_v14  ;;  %v1781_v60 = vld [vmem:[#allocation6 + $0x1d4] ss:$8 sps:$4 sm:$0xff]   ;;  %v1785_v2 = vld [vmem:[#allocation6 + $0x1f0] ss:$8 sps:$4 sm:$0xff]  }
 0x1b4   : > { %v641_v13 = vadd.f32 %v628_v3, %v621_v9  ;;  %v1791_v3 = vld [vmem:[%s2413_s4 + $0x14] ss:$8 sps:$4 sm:$0xff]   ;;  %v1799_v45 = vld [vmem:[%s2413_s4 + $0x30] ss:$8 sps:$4 sm:$0xff]  }
 0x1b5   : > { %v646_v12 = vpack.c.bf16 %v642_v8, %v642_v8  ;;  %v596_v56 = vadd.f32 1e-05, %v592_v19  ;;  %1387 = vmatprep.subr.bf16.mxu1 %v1791_v3  ;;  %v1796_v8 = vld [vmem:[%s2413_s4 + $0x20] ss:$8 sps:$4 sm:$0xff]   ;;  %v1797_v9 = vld [vmem:[%s2413_s4 + $0x34] ss:$8 sps:$4 sm:$0xff]  }
 0x1b6   : > { %v645_v17 = vpack.c.bf16 %v641_v13, %v641_v13  ;;  %1388 = vmatpush1.bf16.msra.mxu1 %v1793_v5  ;;  %v1803_v13 = vld [vmem:[%s2413_s4 + $0x54] ss:$8 sps:$4 sm:$0xff]   ;;  %v1805_v14 = vld [vmem:[%s2413_s4 + $0x50] ss:$8 sps:$4 sm:$0xff]   ;;  %v1812_v19 = vld [vmem:[%s2413_s4 + $0x84] ss:$8 sps:$4 sm:$0xff]  }
 0x1b7   : > { %1073 = vmatprep.mubr.bf16.mxu0 %v646_v12  ;;  %1840 = vrsqrt.f32 %v596_v56  ;;  %1389 = vmatprep.subr.bf16.mxu1 %v1794_v7  ;;  %v1802_v12 = vld [vmem:[%s2413_s4 + $0x40] ss:$8 sps:$4 sm:$0xff]   ;;  %v1815_v56 = vld [vmem:[%s2413_s4 + $0x94] ss:$8 sps:$4 sm:$0xff]  }
 0x1b8   : > { %1074 = vmatmul.mubr.bf16.vlgmr.msra.gmra.mrb[0].mxu0 %v645_v17  ;;  %1842 = vrsqrt.f32 %v595_v22  ;;  %v1809_v17 = vld [vmem:[%s2413_s4 + $0x74] ss:$8 sps:$4 sm:$0xff]   ;;  %v1818_v22 = vld [vmem:[%s2413_s4 + $0xa4] ss:$8 sps:$4 sm:$0xff]  }
 0x1b9   : > { %1083 = vmatpush1.bf16.msra.mxu0 %v1740_v15  ;;  %v1806_v15 = vld [vmem:[%s2413_s4 + $0x64] ss:$8 sps:$4 sm:$0xff]  }
 0x1ba   : > { %1084 = vmatprep.subr.bf16.mxu0 %v1745_v18  ;;  %1390 = vmatpush1.bf16.msra.mxu1 %v1796_v8  ;;  %v1811_v18 = vld [vmem:[%s2413_s4 + $0x70] ss:$8 sps:$4 sm:$0xff]  }
 0x1bb   : > { %1391 = vmatprep.subr.bf16.mxu1 %v1797_v9 }
 0x1bd   : > { %1085 = vmatpush1.bf16.msra.mxu0 %v1743_v21  ;;  %v1817_v21 = vld [vmem:[%s2413_s4 + $0x90] ss:$8 sps:$4 sm:$0xff]  }
 0x1be   : > { %1086 = vmatprep.subr.bf16.mxu0 %v1748_v23  ;;  %1392 = vmatpush1.bf16.msra.mxu1 %v1799_v45  ;;  %v1820_v23 = vld [vmem:[%s2413_s4 + $0xa0] ss:$8 sps:$4 sm:$0xff]  }
 0x1bf   : > { %1393 = vmatprep.subr.bf16.mxu1 %v1800_v10 }
 0x1c1   : > { %1087 = vmatpush1.bf16.msra.mxu0 %v1746_v24  ;;  %v1841_v29 = vpop.eup %1840  ;;  %v1821_v24 = vld [vmem:[%s2413_s4 + $0xb4] ss:$8 sps:$4 sm:$0xff]  }
 0x1c2   : > { %1088 = vmatprep.subr.bf16.mxu0 %v1751_v25  ;;  %v1843_v31 = vpop.eup %1842  ;;  %v604_v33 = vmul.f32 %v1841_v29, %v560_v43  ;;  %v1758_v43 = vld [vmem:[#allocation6 + $0x160] ss:$8 sps:$4 sm:$0xff]   ;;  %1394 = vmatpush1.bf16.msra.mxu1 %v1802_v12  ;;  %v1823_v25 = vld [vmem:[%s2413_s4 + $0xb0] ss:$8 sps:$4 sm:$0xff]  }
 0x1c3   : > { %v603_v36 = vmul.f32 %v1843_v31, %v2242_v44  ;;  %v1766_v44 = vld [vmem:[#allocation6 + $0x184] ss:$8 sps:$4 sm:$0xff]   ;;  %1395 = vmatprep.subr.bf16.mxu1 %v1803_v13  ;;  %v1829_v29 = vld [vmem:[%s2413_s4 + $0xd0] ss:$8 sps:$4 sm:$0xff]   ;;  %v1832_v31 = vld [vmem:[%s2413_s4 + $0xe0] ss:$8 sps:$4 sm:$0xff]  }
 0x1c4   : > { %v624_v38 = vmul.f32 %v620_v28, %v604_v33  ;;  %v1827_v28 = vld [vmem:[%s2413_s4 + $0xd4] ss:$8 sps:$4 sm:$0xff]   ;;  %v1835_v33 = vld [vmem:[%s2413_s4 + $0xf0] ss:$8 sps:$4 sm:$0xff]  }
 0x1c5   : > { %1089 = vmatpush1.bf16.msra.mxu0 %v1749_v26  ;;  %v623_v39 = vmul.f32 %v616_v30, %v603_v36  ;;  %v1824_v26 = vld [vmem:[%s2413_s4 + $0xc4] ss:$8 sps:$4 sm:$0xff]  }
 0x1c6   : > { %1090 = vmatprep.subr.bf16.mxu0 %v1754_v27  ;;  %v644_v41 = vadd.f32 %v640_v34, %v624_v38  ;;  %1396 = vmatpush1.bf16.msra.mxu1 %v1805_v14  ;;  %v1826_v27 = vld [vmem:[%s2413_s4 + $0xc0] ss:$8 sps:$4 sm:$0xff]   ;;  %v1830_v30 = vld [vmem:[%s2413_s4 + $0xe4] ss:$8 sps:$4 sm:$0xff]   ;;  %v715_v34 = vsub.s32 4, %v2184_v63 }
 0x1c7   : > { %v643_v46 = vadd.f32 %v636_v37, %v623_v39  ;;  %1397 = vmatprep.subr.bf16.mxu1 %v1806_v15 }
 0x1c8   : > { %v648_v48 = vpack.c.bf16 %v644_v41, %v644_v41  ;;  %v720_v36 = vrot.slane %v2195_v6, %v715_v34 }
 0x1c9   : > { %1091 = vmatpush1.bf16.msra.mxu0 %v1752_v32  ;;  %v647_v4 = vpack.c.bf16 %v643_v46, %v643_v46  ;;  %v1833_v32 = vld [vmem:[%s2413_s4 + $0xf4] ss:$8 sps:$4 sm:$0xff]  }
 0x1ca   : > { %1092 = vmatprep.subr.bf16.mxu0 %v1757_v35  ;;  %1114 = vmatprep.mubr.bf16.mxu0 %v648_v48  ;;  %v716_v35 = vrot.slane %v2204_v11, %v715_v34  ;;  %v1219_v34 = vsub.s32 7, %v2184_v63 }
 0x1cb   : > { %1398 = vmatpush1.bf16.msra.mxu1 %v1808_v16 }
 0x1cc   : > { %1399 = vmatprep.subr.bf16.mxu1 %v1809_v17 }
 0x1cd   : > { %1093 = vmatpush1.bf16.msra.mxu0 %v1755_v40 }
 0x1ce   : > { %1094 = vmatprep.subr.bf16.mxu0 %v1760_v42 }
 0x1cf   : > { %1400 = vmatpush1.bf16.msra.mxu1 %v1811_v18 }
 0x1d0   : > { %1401 = vmatprep.subr.bf16.mxu1 %v1812_v19  ;;  %v1165_v19 = vsub.s32 5, %v2184_v63 }
 0x1d1   : > { %1095 = vmatpush1.bf16.msra.mxu0 %v1758_v43 }
 0x1d2   : > { %1096 = vmatprep.subr.bf16.mxu0 %v1763_v47 }
 0x1d3   : > { %1402 = vmatpush1.bf16.msra.mxu1 %v1814_v20  ;;  %v1175_v20 = vsub.s32 6, %v2184_v63 }
 0x1d4   : > { %1403 = vmatprep.subr.bf16.mxu1 %v1815_v56  ;;  %v1166_v56 = vrot.slane %v2204_v11, %v1165_v19 }
 0x1d5   : > { %1097 = vmatpush1.bf16.msra.mxu0 %v1761_v49 }
 0x1d6   : > { %1098 = vmatprep.subr.bf16.mxu0 %v1766_v44 }
 0x1d7   : > { %1404 = vmatpush1.bf16.msra.mxu1 %v1817_v21 }
 0x1d8   : > { %1405 = vmatprep.subr.bf16.mxu1 %v1818_v22  ;;  %v1170_v22 = vrot.slane %v2195_v6, %v1165_v19 }
 0x1d9   : > { %1099 = vmatpush1.bf16.msra.mxu0 %v1764_v52 }
 0x1da   : > { %1100 = vmatprep.subr.bf16.mxu0 %v1769_v50 }
 0x1db   : > { %1406 = vmatpush1.bf16.msra.mxu1 %v1820_v23 }
 0x1dc   : > { %1407 = vmatprep.subr.bf16.mxu1 %v1821_v24 }
 0x1dd   : > { %1101 = vmatpush1.bf16.msra.mxu0 %v1767_v51 }
 0x1de   : > { %1102 = vmatprep.subr.bf16.mxu0 %v1772_v53 }
 0x1df   : > { %1408 = vmatpush1.bf16.msra.mxu1 %v1823_v25  ;;  %v1176_v25 = vrot.slane %v2204_v11, %v1175_v20 }
 0x1e0   : > { %1409 = vmatprep.subr.bf16.mxu1 %v1824_v26 }
 0x1e1   : > { %1103 = vmatpush1.bf16.msra.mxu0 %v1770_v54 }
 0x1e2   : > { %1104 = vmatprep.subr.bf16.mxu0 %v1775_v55 }
 0x1e3   : > { %1410 = vmatpush1.bf16.msra.mxu1 %v1826_v27  ;;  %v1180_v27 = vrot.slane %v2195_v6, %v1175_v20 }
 0x1e4   : > { %1411 = vmatprep.subr.bf16.mxu1 %v1827_v28 }
 0x1e5   : > { %1105 = vmatpush1.bf16.msra.mxu0 %v1773_v57 }
 0x1e6   : > { %1106 = vmatprep.subr.bf16.mxu0 %v1778_v58 }
 0x1e7   : > { %1412 = vmatpush1.bf16.msra.mxu1 %v1829_v29 }
 0x1e8   : > { %1413 = vmatprep.subr.bf16.mxu1 %v1830_v30 }
 0x1e9   : > { %1107 = vmatpush1.bf16.msra.mxu0 %v1776_v59 }
 0x1ea   : > { %1108 = vmatprep.subr.bf16.mxu0 %v1781_v60 }
 0x1eb   : > { %1414 = vmatpush1.bf16.msra.mxu1 %v1832_v31 }
 0x1ec   : > { %1415 = vmatprep.subr.bf16.mxu1 %v1833_v32 }
 0x1ed   : > { %1109 = vmatpush1.bf16.msra.mxu0 %v1779_v61 }
 0x1ee   : > { %1110 = vmatprep.subr.bf16.mxu0 %v1784_v62 }
 0x1ef   : > { %1416 = vmatpush1.bf16.msra.mxu1 %v1835_v33 }
 0x1f1   : > { %1111 = vmatpush1.bf16.msra.mxu0 %v1782_v0 }
 0x1f2   : > { %1112 = vmatprep.subr.bf16.mxu0 %v1787_v1 }
 0x1f5   : > { %1113 = vmatpush1.bf16.msra.mxu0 %v1785_v2 }
 0x1f8   : > { %1115 = vmatmul.mubr.bf16.vlgmr.msra.gmra.mrb[0].mxu0 %v647_v4 }
 0x2cb   : > { %v1116_v37 = vpop.f32.mrb[0].mxu0 }
 0x2cc   : > { %v1624_v38 = vadd.f32 %v1116_v37, %v716_v35  ;;  %v1118_v39 = vpop.f32.mrb[1].mxu0  ;;  %v1220_v35 = vrot.slane %v2204_v11, %v1219_v34 }
 0x2cd   : > { %v1625_v40 = vadd.f32 %v1118_v39, %v720_v36  ;;  %v1120_v41 = vpop.f32.mrb[2].mxu0  ;;  %v1224_v36 = vrot.slane %v2195_v6, %v1219_v34 }
 0x2ce   : > { %v1123_v42 = vmax.f32 %v1624_v38, 0.0  ;;  %v1121_v46 = vpop.f32.mrb[3].mxu0 }
 0x2cf   : > { %v1124_v48 = vmax.f32 %v1625_v40, 0.0 }
 0x2d0   : > { %v1125_v43 = vrot.slane %v1123_v42, 4 }
 0x2d1   : > { %v1131_v47 = vrot.slane %v1124_v48, 4 }
 0x2d2   : > { %v1126_v49 = vadd.f32 %v1125_v43, %v1123_v42 }
 0x2d3   : > { %v1132_v44 = vadd.f32 %v1131_v47, %v1124_v48 }
 0x2d4   : > { %v1127_v52 = vrot.slane %v1126_v49, 2 }
 0x2d5   : > { %v1133_v50 = vrot.slane %v1132_v44, 2 }
 0x2d6   : > { %v1128_v51 = vadd.f32 %v1127_v52, %v1126_v49 }
 0x2d7   : > { %v1134_v53 = vadd.f32 %v1133_v50, %v1132_v44 }
 0x2d8   : > { %v1129_v54 = vrot.slane %v1128_v51, 1 }
 0x2d9   : > { %v1135_v55 = vrot.slane %v1134_v53, 1 }
 0x2da   : > { %v1130_v57 = vadd.f32 %v1129_v54, %v1128_v51 }
 0x2db   : > { %v1136_v58 = vadd.f32 %v1135_v55, %v1134_v53 }
 0x2dc   : > { %v1137_v59 = vmul.f32 0.125, %v1130_v57 }
 0x2dd   : > { %v1138_v60 = vmul.f32 0.125, %v1136_v58 }
 0x2de   : > { %v1139_v61 = vsub.f32 %v1123_v42, %v1137_v59 }
 0x2df   : > { %v1140_v62 = vsub.f32 %v1124_v48, %v1138_v60 }
 0x2e0   : > { %v1141_v0 = vmul.f32 %v1139_v61, %v1139_v61 }
 0x2e1   : > { %v1142_v1 = vmul.f32 %v1140_v62, %v1140_v62 }
 0x2e2   : > { %v1143_v2 = vrot.slane %v1141_v0, 4 }
 0x2e3   : > { %v1149_v4 = vrot.slane %v1142_v1, 4 }
 0x2e4   : > { %v1144_v3 = vadd.f32 %v1143_v2, %v1141_v0 }
 0x2e5   : > { %v1150_v5 = vadd.f32 %v1149_v4, %v1142_v1 }
 0x2e6   : > { %v1145_v7 = vrot.slane %v1144_v3, 2 }
 0x2e7   : > { %v1151_v8 = vrot.slane %v1150_v5, 2 }
 0x2e8   : > { %v1146_v9 = vadd.f32 %v1145_v7, %v1144_v3 }
 0x2e9   : > { %v1152_v45 = vadd.f32 %v1151_v8, %v1150_v5 }
 0x2ea   : > { %v1147_v10 = vrot.slane %v1146_v9, 1 }
 0x2eb   : > { %v1153_v12 = vrot.slane %v1152_v45, 1 }
 0x2ec   : > { %v1148_v13 = vadd.f32 %v1147_v10, %v1146_v9 }
 0x2ed   : > { %v1154_v14 = vadd.f32 %v1153_v12, %v1152_v45 }
 0x2ee   : > { %v1155_v15 = vmul.f32 0.125, %v1148_v13 }
 0x2ef   : > { %v1156_v16 = vmul.f32 0.125, %v1154_v14 }
 0x2f0   : > { %v1157_v17 = vadd.f32 1e-05, %v1155_v15 }
 0x2f1   : > { %v1158_v18 = vadd.f32 1e-05, %v1156_v16 }
 0x2f2   : > { %1844 = vrsqrt.f32 %v1157_v17 }
 0x2f3   : > { %1846 = vrsqrt.f32 %v1158_v18 }
 0x2fc   : > { %v1845_v21 = vpop.eup %1844 }
 0x2fd   : > { %v1847_v23 = vpop.eup %1846  ;;  %v1161_v24 = vmul.f32 %v1845_v21, %v1139_v61 }
 0x2fe   : > { %v1162_v26 = vmul.f32 %v1847_v23, %v1140_v62 }
 0x2ff   : > { %v1171_v28 = vmul.f32 %v1166_v56, %v1161_v24 }
 0x300   : > { %v1172_v29 = vmul.f32 %v1170_v22, %v1162_v26 }
 0x301   : > { %v1181_v30 = vadd.f32 %v1176_v25, %v1171_v28 }
 0x302   : > { %v1182_v31 = vadd.f32 %v1180_v27, %v1172_v29 }
 0x303   : > { %v1183_v33 = vpack.c.bf16 %v1181_v30, %v1181_v30 }
 0x304   : > { %v1184_v32 = vpack.c.bf16 %v1182_v31, %v1182_v31 }
 0x306   : > { %1417 = vmatprep.mubr.bf16.mxu1 %v1184_v32 }
 0x307   : > { %1418 = vmatmul.mubr.bf16.vlgmr.msra.gmra.mrb[0].mxu1 %v1183_v33 }
 0x3da   : > { %v1419_v37 = vpop.f32.mrb[0].mxu1 }
 0x3db   : > { %v1420_v38 = vadd.f32 %v1419_v37, %v1220_v35  ;;  %v1421_v39 = vpop.f32.mrb[1].mxu1 }
 0x3dc   : > { %v1422_v40 = vadd.f32 %v1421_v39, %v1224_v36  ;;  %v1423_v41 = vpop.f32.mrb[2].mxu1 }
 0x3dd   : > { %1426 = vst [vmem:[#allocation8] sm:$0xff] %v1420_v38  ;;  %v1424_v42 = vpop.f32.mrb[3].mxu1 }
 0x3de   : > { %1427 = vst [vmem:[#allocation8 + $0x8] sm:$0xff] %v1422_v40 }
 0x3df PF: > { %p1651_p1 = scmp.eq.s32.totalorder %s2033_s22, 2  ;;  %s1983_s26 = smov [#allocation8]  }
 0x3e0   : > { %s1435_s30 = sshll.u32 %s1983_s26, 4  ;;  %s1436_s30 = int_to_ptr.vmem [resolvable:$true] %s1435_s30 }
 0x3e1   : > { %s1906_s11 = scalar_lea.vmem %s1436_s30, 256  ;;  %p1913_p12 = scmp.lt.s32.totalorder %s1436_s30, %s1436_s30 }
 0x3e2   : > { %p1907_p4 = scmp.ne.s32.totalorder %s1436_s30, %s1906_s11  ;;  %p1914_p0 = scmp.lt.s32.totalorder %s1906_s11, %s1906_s11 }
 0x3e4   : > { %p1908_p5 = pnand %p1907_p4, %p1651_p1  ;;  %p1915_p2 = por %p1914_p0, %p1913_p12 }
 0x3e6   : > { %p1909_p8 = pneg %p1908_p5 }
 0x3e8   : > { %p1916_p11 = pnand %p1915_p2, %p1909_p8 }
 0x3ea   : > { %1919 = shalt.err (!%p1916_p11)
}
 0x3eb   : > { %s1920_s27 = scalar_lea.hbm %s2414_s5, 256 }
 0x3ec   : > { %p1921_p13 = scmp.ne.s32.totalorder %s2414_s5, %s1920_s27  ;;  %p1926_p7 = scmp.lt.u32.totalorder %s1920_s27, %s2414_s5 }
 0x3ee   : > { %p1922_p3 = pnand %p1921_p13, %p1651_p1 }
 0x3f0   : > { %p1923_p6 = pneg %p1922_p3 }
 0x3f2   : > { %p1928_p9 = pnand %p1926_p7, %p1923_p6 }
 0x3f4   : > { %1931 = shalt.err (!%p1928_p9)
}
 0x3f5   : > { %1637 = dma.vmem_to_hbm [thread:$0]  (%p1651_p1), %s1436_s30, 256, %s2414_s5, [#allocation5]  }
 0x3f6   : > { %1957 = dma.done.wait (%p1651_p1), [#allocation5], 256  }
 0x3f7   : > { %1959 = vsyncadd (%p1651_p1), [#allocation5], 4294967040 }
 0x3f8 PF: > { %s2427_s15 = smov %s2085_s18  ;;  %p17_p10 = scmp.ge.s32.totalorder %s2059_s28, 5  }
 0x3f9   : > { %s2428_s18 = smov %s1966_s19  ;;  %s2429_s19 = smov %s1970_s20 }
 0x3fa   : > { %s2430_s20 = smov %s2427_s15  ;;  %s2431_s21 = smov %s2059_s28 }
 0x3fb   :  { %19 = sbr.rel (!%p17_p10) target bundleno = 5 (0x5), region = 92 }
 0x402   :  { %1448 = vsyncpa [#allocation4], 1 }
 0x403   :  { %1450 = vsyncpa [#allocation4 + $0x1], 1 }
 0x404   :  { %1451 = vsyncpa [#allocation7], 1 }
 0x405   :  { %1452 = vsyncpa [#allocation5], 1 }
 0x406   :  { %1454 = vsyncpa [#allocation5 + $0x1], 1 }

</bundles_post_ra>
